<compile_context>
chip_gen: v7x
topology: tpu7x:2x2x1
jax: 0.10.0
libtpu: 0.0.40
codegen_flags: <defaults>
</compile_context>

<pallas_src>
import jax
import jax.numpy as jnp
from jax.experimental import pallas as pl
from jax.experimental.pallas import tpu as pltpu


THRESH = 1e-6


def _encoder_kernel(x_ref,                                    # (T*Bp, H1)  = w1[phrase]
                    b1_ref,                                   # (1, H1)
                    w2_ref, b2_ref,                           # (H1, E), (1, E)
                    wih_r_ref, wih_z_ref, wih_n_ref,          # (E, H) each
                    bih_r_ref, bih_z_ref, bih_n_ref,          # (1, H) each
                    whh_r_ref, whh_z_ref, whh_n_ref,          # (H, H) each
                    bhh_r_ref, bhh_z_ref, bhh_n_ref,          # (1, H) each
                    wlin_ref, blin_ref,                       # (H, Dp), (1, Dp)
                    out_ref,                                  # (Bp, Dp)
                    gi_r_ref, gi_z_ref, gi_n_ref):            # scratch: (T*Bp, H) f32
    TBp, _ = x_ref.shape
    Bp = out_ref.shape[0]
    T = TBp // Bp
    H = whh_r_ref.shape[0]

    # ---- time-independent (batched over all T*Bp rows) ------------------------------
    # embedding MLP: (gathered w1 rows) + b1 -> Threshold -> Linear -> Threshold
    h1 = x_ref[...] + b1_ref[...]
    h1 = jnp.where(h1 > THRESH, h1, 0.0)
    emb = jnp.dot(h1, w2_ref[...], preferred_element_type=jnp.float32) + b2_ref[...]
    emb = jnp.where(emb > THRESH, emb, 0.0)                                 # (T*Bp, E)

    # GRU input projections for all timesteps at once (one big MXU pass per gate).
    gi_r_ref[...] = jnp.dot(emb, wih_r_ref[...],
                            preferred_element_type=jnp.float32) + bih_r_ref[...]
    gi_z_ref[...] = jnp.dot(emb, wih_z_ref[...],
                            preferred_element_type=jnp.float32) + bih_z_ref[...]
    gi_n_ref[...] = jnp.dot(emb, wih_n_ref[...],
                            preferred_element_type=jnp.float32) + bih_n_ref[...]

    # Hoist recurrent weights/biases out of the loop.
    whh_r = whh_r_ref[...]
    whh_z = whh_z_ref[...]
    whh_n = whh_n_ref[...]
    bhh_r = bhh_r_ref[...]
    bhh_z = bhh_z_ref[...]
    bhh_n = bhh_n_ref[...]

    # ---- sequential GRU recurrence (PyTorch semantics) -------------------------------
    def step(t, h_prev):
        row = pl.multiple_of(t * Bp, Bp)                      # sublane-aligned offset
        gi_r = gi_r_ref[pl.ds(row, Bp), :]
        gi_z = gi_z_ref[pl.ds(row, Bp), :]
        gi_n = gi_n_ref[pl.ds(row, Bp), :]
        gh_r = jnp.dot(h_prev, whh_r, preferred_element_type=jnp.float32) + bhh_r
        gh_z = jnp.dot(h_prev, whh_z, preferred_element_type=jnp.float32) + bhh_z
        gh_n = jnp.dot(h_prev, whh_n, preferred_element_type=jnp.float32) + bhh_n
        r = jax.nn.sigmoid(gi_r + gh_r)
        z = jax.nn.sigmoid(gi_z + gh_z)
        n = jnp.tanh(gi_n + r * gh_n)
        return (1.0 - z) * n + z * h_prev

    h0 = jnp.zeros((Bp, H), jnp.float32)
    h_last = jax.lax.fori_loop(0, T, step, h0, unroll=True)

    # ---- final projection ([Dropout=id] -> Linear), lane-dense store ----------------
    out_ref[...] = (jnp.dot(h_last, wlin_ref[...], preferred_element_type=jnp.float32)
                    + blin_ref[...]).astype(out_ref.dtype)


def _full_spec(a):
    n = a.ndim
    return pl.BlockSpec(a.shape, lambda i, n=n: (0,) * n)


def encoder_forward(phrase, params):
    """phrase: int32 (T, B).  Returns (1, B, enc_dim) float32, matching PyTorch module."""
    T, B = phrase.shape
    H1 = params["w1"].shape[1]
    E = params["w2"].shape[1]
    H = params["whh"].shape[0]
    D = params["wlin"].shape[1]

    Bp = ((B + 7) // 8) * 8                 # pad batch to full sublanes
    Dp = ((D + 127) // 128) * 128           # pad output lanes -> unmasked stores

    # one_hot(phrase) @ w1  ==  w1[phrase]  (embedding lookup; glue, like one_hot was).
    phrase_p = jnp.pad(phrase, ((0, 0), (0, Bp - B)))                       # (T, Bp)
    x1 = jnp.take(params["w1"], phrase_p.reshape(-1), axis=0)              # (T*Bp, H1)
    x1 = x1.astype(jnp.float32)

    # Split GRU gate weights (PyTorch order r, z, n) for lane-aligned gate math.
    wih, whh = params["wih"], params["whh"]
    bih, bhh = params["bih"], params["bhh"]
    wih_r, wih_z, wih_n = wih[:, :H], wih[:, H:2 * H], wih[:, 2 * H:]
    whh_r, whh_z, whh_n = whh[:, :H], whh[:, H:2 * H], whh[:, 2 * H:]
    bih_r, bih_z, bih_n = bih[:, :H], bih[:, H:2 * H], bih[:, 2 * H:]
    bhh_r, bhh_z, bhh_n = bhh[:, :H], bhh[:, H:2 * H], bhh[:, 2 * H:]

    # Lane-dense (padded) final projection.
    wlin_p = jnp.pad(params["wlin"], ((0, 0), (0, Dp - D)))
    blin_p = jnp.pad(params["blin"], ((0, 0), (0, Dp - D)))

    args = (x1, params["b1"], params["w2"], params["b2"],
            wih_r, wih_z, wih_n, bih_r, bih_z, bih_n,
            whh_r, whh_z, whh_n, bhh_r, bhh_z, bhh_n,
            wlin_p, blin_p)

    # TODO(synk): for large batches, add a leading batch-block grid axis marked
    # "parallel" to shard independent sequences across the two v7x TensorCores.
    out = pl.pallas_call(
        _encoder_kernel,
        out_shape=jax.ShapeDtypeStruct((Bp, Dp), jnp.float32),
        grid_spec=pltpu.PrefetchScalarGridSpec(
            num_scalar_prefetch=0,
            grid=(1,),
            in_specs=[_full_spec(a) for a in args],
            out_specs=pl.BlockSpec((Bp, Dp), lambda i: (0, 0)),
            scratch_shapes=[pltpu.VMEM((T * Bp, H), jnp.float32)] * 3,
        ),
        compiler_params=pltpu.CompilerParams(
            dimension_semantics=("arbitrary",),
        ),
    )(*args)

    return out[None, :B, :D]                                                # (1, B, D)


def encoder_reference(phrase, params):
    """Pure-JAX reference with the module's exact math (for verification)."""
    V = params["w1"].shape[0]
    H = params["whh"].shape[0]
    onehot = jax.nn.one_hot(phrase, V, dtype=jnp.float32)                   # (T, B, V)
    h1 = onehot @ params["w1"] + params["b1"][0]
    h1 = jnp.where(h1 > THRESH, h1, 0.0)
    emb = h1 @ params["w2"] + params["b2"][0]
    emb = jnp.where(emb > THRESH, emb, 0.0)                                 # (T, B, E)

    def gru_step(h, x_t):
        gi = x_t @ params["wih"] + params["bih"][0]
        gh = h @ params["whh"] + params["bhh"][0]
        i_r, i_z, i_n = gi[:, :H], gi[:, H:2 * H], gi[:, 2 * H:]
        h_r, h_z, h_n = gh[:, :H], gh[:, H:2 * H], gh[:, 2 * H:]
        r = jax.nn.sigmoid(i_r + h_r)
        z = jax.nn.sigmoid(i_z + h_z)
        n = jnp.tanh(i_n + r * h_n)
        return (1.0 - z) * n + z * h, None

    B = phrase.shape[1]
    h0 = jnp.zeros((B, H), jnp.float32)
    h_last, _ = jax.lax.scan(gru_step, h0, emb)
    out = h_last @ params["wlin"] + params["blin"][0]
    return out[None, :, :]


def init_params(key, vocab_sz, emb_hid_dim, emb_dim, enc_rnn_dim, enc_dim):
    ks = jax.random.split(key, 11)
    s = 0.1
    return {
        "w1":   s * jax.random.normal(ks[0], (vocab_sz, emb_hid_dim), jnp.float32),
        "b1":   s * jax.random.normal(ks[1], (1, emb_hid_dim), jnp.float32),
        "w2":   s * jax.random.normal(ks[2], (emb_hid_dim, emb_dim), jnp.float32),
        "b2":   s * jax.random.normal(ks[3], (1, emb_dim), jnp.float32),
        "wih":  s * jax.random.normal(ks[4], (emb_dim, 3 * enc_rnn_dim), jnp.float32),
        "whh":  s * jax.random.normal(ks[5], (enc_rnn_dim, 3 * enc_rnn_dim), jnp.float32),
        "bih":  s * jax.random.normal(ks[6], (1, 3 * enc_rnn_dim), jnp.float32),
        "bhh":  s * jax.random.normal(ks[7], (1, 3 * enc_rnn_dim), jnp.float32),
        "wlin": s * jax.random.normal(ks[8], (enc_rnn_dim, enc_dim), jnp.float32),
        "blin": s * jax.random.normal(ks[9], (1, enc_dim), jnp.float32),
    }


if __name__ == "__main__":
    # Small config consistent with the module's opt dict.
    opt = dict(max_seq_len=8, vocab_sz=16, emb_hid_dim=32, emb_dim=16,
               enc_rnn_dim=32, enc_dim=32, enc_dropout=0.0)

    key = jax.random.PRNGKey(0)
    k_param, k_phrase = jax.random.split(key)
    params = init_params(k_param, opt["vocab_sz"], opt["emb_hid_dim"],
                         opt["emb_dim"], opt["enc_rnn_dim"], opt["enc_dim"])

    T, B = opt["max_seq_len"], 4
    phrase = jax.random.randint(k_phrase, (T, B), 0, opt["vocab_sz"], dtype=jnp.int32)

    out = jax.block_until_ready(encoder_forward(phrase, params))
    ref = jax.block_until_ready(encoder_reference(phrase, params))

    assert out.shape == (1, B, opt["enc_dim"])
    assert jnp.allclose(out, ref, atol=2e-5, rtol=2e-5), "mismatch vs reference"

    print("KERNEL_OK")
</pallas_src>

<mosaic_0001>
module attributes {stable_mosaic.version = 11 : i64} {
  func.func @_encoder_kernel(%arg0: i32, %arg1: memref<64x32xf32, #tpu.memory_space<vmem>>, %arg2: memref<1x32xf32, #tpu.memory_space<vmem>>, %arg3: memref<32x16xf32, #tpu.memory_space<vmem>>, %arg4: memref<1x16xf32, #tpu.memory_space<vmem>>, %arg5: memref<16x32xf32, #tpu.memory_space<vmem>>, %arg6: memref<16x32xf32, #tpu.memory_space<vmem>>, %arg7: memref<16x32xf32, #tpu.memory_space<vmem>>, %arg8: memref<1x32xf32, #tpu.memory_space<vmem>>, %arg9: memref<1x32xf32, #tpu.memory_space<vmem>>, %arg10: memref<1x32xf32, #tpu.memory_space<vmem>>, %arg11: memref<32x32xf32, #tpu.memory_space<vmem>>, %arg12: memref<32x32xf32, #tpu.memory_space<vmem>>, %arg13: memref<32x32xf32, #tpu.memory_space<vmem>>, %arg14: memref<1x32xf32, #tpu.memory_space<vmem>>, %arg15: memref<1x32xf32, #tpu.memory_space<vmem>>, %arg16: memref<1x32xf32, #tpu.memory_space<vmem>>, %arg17: memref<32x128xf32, #tpu.memory_space<vmem>>, %arg18: memref<1x128xf32, #tpu.memory_space<vmem>>, %arg19: memref<8x128xf32, #tpu.memory_space<vmem>>, %arg20: memref<64x32xf32, #tpu.memory_space<vmem>>, %arg21: memref<64x32xf32, #tpu.memory_space<vmem>>, %arg22: memref<64x32xf32, #tpu.memory_space<vmem>>) attributes {dimension_semantics = [#tpu.dimension_semantics<arbitrary>], iteration_bounds = array<i64: 1>, scalar_prefetch = 0 : i64, scratch_operands = 3 : i64, tpu.core_type = #tpu.core_type<tc>, window_params = [{pipeline_mode = #tpu.pipeline_mode<synchronous>, transform_indices = @transform_0, window_bounds = array<i64: 64, 32>}, {pipeline_mode = #tpu.pipeline_mode<synchronous>, transform_indices = @transform_1, window_bounds = array<i64: 1, 32>}, {pipeline_mode = #tpu.pipeline_mode<synchronous>, transform_indices = @transform_2, window_bounds = array<i64: 32, 16>}, {pipeline_mode = #tpu.pipeline_mode<synchronous>, transform_indices = @transform_3, window_bounds = array<i64: 1, 16>}, {pipeline_mode = #tpu.pipeline_mode<synchronous>, transform_indices = @transform_4, window_bounds = array<i64: 16, 32>}, {pipeline_mode = #tpu.pipeline_mode<synchronous>, transform_indices = @transform_5, window_bounds = array<i64: 16, 32>}, {pipeline_mode = #tpu.pipeline_mode<synchronous>, transform_indices = @transform_6, window_bounds = array<i64: 16, 32>}, {pipeline_mode = #tpu.pipeline_mode<synchronous>, transform_indices = @transform_7, window_bounds = array<i64: 1, 32>}, {pipeline_mode = #tpu.pipeline_mode<synchronous>, transform_indices = @transform_8, window_bounds = array<i64: 1, 32>}, {pipeline_mode = #tpu.pipeline_mode<synchronous>, transform_indices = @transform_9, window_bounds = array<i64: 1, 32>}, {pipeline_mode = #tpu.pipeline_mode<synchronous>, transform_indices = @transform_10, window_bounds = array<i64: 32, 32>}, {pipeline_mode = #tpu.pipeline_mode<synchronous>, transform_indices = @transform_11, window_bounds = array<i64: 32, 32>}, {pipeline_mode = #tpu.pipeline_mode<synchronous>, transform_indices = @transform_12, window_bounds = array<i64: 32, 32>}, {pipeline_mode = #tpu.pipeline_mode<synchronous>, transform_indices = @transform_13, window_bounds = array<i64: 1, 32>}, {pipeline_mode = #tpu.pipeline_mode<synchronous>, transform_indices = @transform_14, window_bounds = array<i64: 1, 32>}, {pipeline_mode = #tpu.pipeline_mode<synchronous>, transform_indices = @transform_15, window_bounds = array<i64: 1, 32>}, {pipeline_mode = #tpu.pipeline_mode<synchronous>, transform_indices = @transform_16, window_bounds = array<i64: 32, 128>}, {pipeline_mode = #tpu.pipeline_mode<synchronous>, transform_indices = @transform_17, window_bounds = array<i64: 1, 128>}, {pipeline_mode = #tpu.pipeline_mode<synchronous>, transform_indices = @transform_18, window_bounds = array<i64: 8, 128>}]} {
    %c0 = arith.constant 0 : index
    %c0_0 = arith.constant 0 : index
    %0 = vector.load %arg1[%c0, %c0_0] : memref<64x32xf32, #tpu.memory_space<vmem>>, vector<64x32xf32>
    %c0_1 = arith.constant 0 : index
    %c0_2 = arith.constant 0 : index
    %1 = vector.load %arg2[%c0_1, %c0_2] : memref<1x32xf32, #tpu.memory_space<vmem>>, vector<1x32xf32>
    %2 = vector.broadcast %1 : vector<1x32xf32> to vector<64x32xf32>
    %3 = arith.addf %0, %2 : vector<64x32xf32>
    %cst = arith.constant 9.99999997E-7 : f32
    %4 = vector.broadcast %cst : f32 to vector<64x32xf32>
    %5 = arith.cmpf ogt, %3, %4 : vector<64x32xf32>
    %cst_3 = arith.constant 0.000000e+00 : f32
    %6 = vector.broadcast %cst_3 : f32 to vector<64x32xf32>
    %7 = arith.select %5, %3, %6 : vector<64x32xi1>, vector<64x32xf32>
    %c0_4 = arith.constant 0 : index
    %c0_5 = arith.constant 0 : index
    %8 = vector.load %arg3[%c0_4, %c0_5] : memref<32x16xf32, #tpu.memory_space<vmem>>, vector<32x16xf32>
    %cst_6 = arith.constant dense<0.000000e+00> : vector<64x16xf32>
    %9 = tpu.matmul %7, %8, %cst_6 {dimension_numbers = #tpu.dot_dimension_numbers<[1], [0], [0], [1], [0, 0, 1, 1], [], []>} : vector<64x32xf32>, vector<32x16xf32>, vector<64x16xf32> -> vector<64x16xf32>
    %c0_7 = arith.constant 0 : index
    %c0_8 = arith.constant 0 : index
    %10 = vector.load %arg4[%c0_7, %c0_8] : memref<1x16xf32, #tpu.memory_space<vmem>>, vector<1x16xf32>
    %11 = vector.broadcast %10 : vector<1x16xf32> to vector<64x16xf32>
    %12 = arith.addf %9, %11 : vector<64x16xf32>
    %cst_9 = arith.constant 9.99999997E-7 : f32
    %13 = vector.broadcast %cst_9 : f32 to vector<64x16xf32>
    %14 = arith.cmpf ogt, %12, %13 : vector<64x16xf32>
    %cst_10 = arith.constant 0.000000e+00 : f32
    %15 = vector.broadcast %cst_10 : f32 to vector<64x16xf32>
    %16 = arith.select %14, %12, %15 : vector<64x16xi1>, vector<64x16xf32>
    %c0_11 = arith.constant 0 : index
    %c0_12 = arith.constant 0 : index
    %17 = vector.load %arg5[%c0_11, %c0_12] : memref<16x32xf32, #tpu.memory_space<vmem>>, vector<16x32xf32>
    %cst_13 = arith.constant dense<0.000000e+00> : vector<64x32xf32>
    %18 = tpu.matmul %16, %17, %cst_13 {dimension_numbers = #tpu.dot_dimension_numbers<[1], [0], [0], [1], [0, 0, 1, 1], [], []>} : vector<64x16xf32>, vector<16x32xf32>, vector<64x32xf32> -> vector<64x32xf32>
    %c0_14 = arith.constant 0 : index
    %c0_15 = arith.constant 0 : index
    %19 = vector.load %arg8[%c0_14, %c0_15] : memref<1x32xf32, #tpu.memory_space<vmem>>, vector<1x32xf32>
    %20 = vector.broadcast %19 : vector<1x32xf32> to vector<64x32xf32>
    %21 = arith.addf %18, %20 : vector<64x32xf32>
    %c0_16 = arith.constant 0 : index
    %c0_17 = arith.constant 0 : index
    %22 = vector.load %arg20[%c0_16, %c0_17] : memref<64x32xf32, #tpu.memory_space<vmem>>, vector<64x32xf32>
    tpu.vector_store %arg20[%c0_16, %c0_17], %21 {strides = array<i32>} : memref<64x32xf32, #tpu.memory_space<vmem>>, vector<64x32xf32>,
    %c0_18 = arith.constant 0 : index
    %c0_19 = arith.constant 0 : index
    %23 = vector.load %arg6[%c0_18, %c0_19] : memref<16x32xf32, #tpu.memory_space<vmem>>, vector<16x32xf32>
    %cst_20 = arith.constant dense<0.000000e+00> : vector<64x32xf32>
    %24 = tpu.matmul %16, %23, %cst_20 {dimension_numbers = #tpu.dot_dimension_numbers<[1], [0], [0], [1], [0, 0, 1, 1], [], []>} : vector<64x16xf32>, vector<16x32xf32>, vector<64x32xf32> -> vector<64x32xf32>
    %c0_21 = arith.constant 0 : index
    %c0_22 = arith.constant 0 : index
    %25 = vector.load %arg9[%c0_21, %c0_22] : memref<1x32xf32, #tpu.memory_space<vmem>>, vector<1x32xf32>
    %26 = vector.broadcast %25 : vector<1x32xf32> to vector<64x32xf32>
    %27 = arith.addf %24, %26 : vector<64x32xf32>
    %c0_23 = arith.constant 0 : index
    %c0_24 = arith.constant 0 : index
    %28 = vector.load %arg21[%c0_23, %c0_24] : memref<64x32xf32, #tpu.memory_space<vmem>>, vector<64x32xf32>
    tpu.vector_store %arg21[%c0_23, %c0_24], %27 {strides = array<i32>} : memref<64x32xf32, #tpu.memory_space<vmem>>, vector<64x32xf32>,
    %c0_25 = arith.constant 0 : index
    %c0_26 = arith.constant 0 : index
    %29 = vector.load %arg7[%c0_25, %c0_26] : memref<16x32xf32, #tpu.memory_space<vmem>>, vector<16x32xf32>
    %cst_27 = arith.constant dense<0.000000e+00> : vector<64x32xf32>
    %30 = tpu.matmul %16, %29, %cst_27 {dimension_numbers = #tpu.dot_dimension_numbers<[1], [0], [0], [1], [0, 0, 1, 1], [], []>} : vector<64x16xf32>, vector<16x32xf32>, vector<64x32xf32> -> vector<64x32xf32>
    %c0_28 = arith.constant 0 : index
    %c0_29 = arith.constant 0 : index
    %31 = vector.load %arg10[%c0_28, %c0_29] : memref<1x32xf32, #tpu.memory_space<vmem>>, vector<1x32xf32>
    %32 = vector.broadcast %31 : vector<1x32xf32> to vector<64x32xf32>
    %33 = arith.addf %30, %32 : vector<64x32xf32>
    %c0_30 = arith.constant 0 : index
    %c0_31 = arith.constant 0 : index
    %34 = vector.load %arg22[%c0_30, %c0_31] : memref<64x32xf32, #tpu.memory_space<vmem>>, vector<64x32xf32>
    tpu.vector_store %arg22[%c0_30, %c0_31], %33 {strides = array<i32>} : memref<64x32xf32, #tpu.memory_space<vmem>>, vector<64x32xf32>,
    %c0_32 = arith.constant 0 : index
    %c0_33 = arith.constant 0 : index
    %35 = vector.load %arg11[%c0_32, %c0_33] : memref<32x32xf32, #tpu.memory_space<vmem>>, vector<32x32xf32>
    %c0_34 = arith.constant 0 : index
    %c0_35 = arith.constant 0 : index
    %36 = vector.load %arg12[%c0_34, %c0_35] : memref<32x32xf32, #tpu.memory_space<vmem>>, vector<32x32xf32>
    %c0_36 = arith.constant 0 : index
    %c0_37 = arith.constant 0 : index
    %37 = vector.load %arg13[%c0_36, %c0_37] : memref<32x32xf32, #tpu.memory_space<vmem>>, vector<32x32xf32>
    %c0_38 = arith.constant 0 : index
    %c0_39 = arith.constant 0 : index
    %38 = vector.load %arg14[%c0_38, %c0_39] : memref<1x32xf32, #tpu.memory_space<vmem>>, vector<1x32xf32>
    %c0_40 = arith.constant 0 : index
    %c0_41 = arith.constant 0 : index
    %39 = vector.load %arg15[%c0_40, %c0_41] : memref<1x32xf32, #tpu.memory_space<vmem>>, vector<1x32xf32>
    %c0_42 = arith.constant 0 : index
    %c0_43 = arith.constant 0 : index
    %40 = vector.load %arg16[%c0_42, %c0_43] : memref<1x32xf32, #tpu.memory_space<vmem>>, vector<1x32xf32>
    %cst_44 = arith.constant 0.000000e+00 : f32
    %41 = vector.broadcast %cst_44 : f32 to vector<8x32xf32>
    %c0_i32 = arith.constant 0 : i32
    %c8_i32 = arith.constant 8 : i32
    %42 = arith.muli %c0_i32, %c8_i32 : i32
    %43 = tpu.assume_multiple %42, 8 : i32
    %44 = arith.index_cast %43 : i32 to index
    %c0_45 = arith.constant 0 : index
    %45 = vector.load %arg20[%44, %c0_45] : memref<64x32xf32, #tpu.memory_space<vmem>>, vector<8x32xf32>
    %46 = arith.index_cast %43 : i32 to index
    %c0_46 = arith.constant 0 : index
    %47 = vector.load %arg21[%46, %c0_46] : memref<64x32xf32, #tpu.memory_space<vmem>>, vector<8x32xf32>
    %48 = arith.index_cast %43 : i32 to index
    %c0_47 = arith.constant 0 : index
    %49 = vector.load %arg22[%48, %c0_47] : memref<64x32xf32, #tpu.memory_space<vmem>>, vector<8x32xf32>
    %cst_48 = arith.constant dense<0.000000e+00> : vector<8x32xf32>
    %50 = tpu.matmul %41, %35, %cst_48 {dimension_numbers = #tpu.dot_dimension_numbers<[1], [0], [0], [1], [0, 0, 1, 1], [], []>} : vector<8x32xf32>, vector<32x32xf32>, vector<8x32xf32> -> vector<8x32xf32>
    %51 = vector.broadcast %38 : vector<1x32xf32> to vector<8x32xf32>
    %52 = arith.addf %50, %51 : vector<8x32xf32>
    %cst_49 = arith.constant dense<0.000000e+00> : vector<8x32xf32>
    %53 = tpu.matmul %41, %36, %cst_49 {dimension_numbers = #tpu.dot_dimension_numbers<[1], [0], [0], [1], [0, 0, 1, 1], [], []>} : vector<8x32xf32>, vector<32x32xf32>, vector<8x32xf32> -> vector<8x32xf32>
    %54 = vector.broadcast %39 : vector<1x32xf32> to vector<8x32xf32>
    %55 = arith.addf %53, %54 : vector<8x32xf32>
    %cst_50 = arith.constant dense<0.000000e+00> : vector<8x32xf32>
    %56 = tpu.matmul %41, %37, %cst_50 {dimension_numbers = #tpu.dot_dimension_numbers<[1], [0], [0], [1], [0, 0, 1, 1], [], []>} : vector<8x32xf32>, vector<32x32xf32>, vector<8x32xf32> -> vector<8x32xf32>
    %57 = vector.broadcast %40 : vector<1x32xf32> to vector<8x32xf32>
    %58 = arith.addf %56, %57 : vector<8x32xf32>
    %59 = arith.addf %45, %52 : vector<8x32xf32>
    %60 = arith.negf %59 : vector<8x32xf32>
    %61 = math.exp %60 : vector<8x32xf32>
    %cst_51 = arith.constant 1.000000e+00 : f32
    %62 = vector.broadcast %cst_51 : f32 to vector<8x32xf32>
    %63 = arith.addf %62, %61 : vector<8x32xf32>
    %64 = arith.divf %62, %63 : vector<8x32xf32>
    %65 = arith.addf %47, %55 : vector<8x32xf32>
    %66 = arith.negf %65 : vector<8x32xf32>
    %67 = math.exp %66 : vector<8x32xf32>
    %cst_52 = arith.constant 1.000000e+00 : f32
    %68 = vector.broadcast %cst_52 : f32 to vector<8x32xf32>
    %69 = arith.addf %68, %67 : vector<8x32xf32>
    %70 = arith.divf %68, %69 : vector<8x32xf32>
    %71 = arith.mulf %64, %58 : vector<8x32xf32>
    %72 = arith.addf %49, %71 : vector<8x32xf32>
    %73 = math.tanh %72 : vector<8x32xf32>
    %cst_53 = arith.constant 1.000000e+00 : f32
    %74 = vector.broadcast %cst_53 : f32 to vector<8x32xf32>
    %75 = arith.subf %74, %70 : vector<8x32xf32>
    %76 = arith.mulf %75, %73 : vector<8x32xf32>
    %77 = arith.mulf %70, %41 : vector<8x32xf32>
    %78 = arith.addf %76, %77 : vector<8x32xf32>
    %c1_i32 = arith.constant 1 : i32
    %c8_i32_54 = arith.constant 8 : i32
    %79 = arith.muli %c1_i32, %c8_i32_54 : i32
    %80 = tpu.assume_multiple %79, 8 : i32
    %81 = arith.index_cast %80 : i32 to index
    %c0_55 = arith.constant 0 : index
    %82 = vector.load %arg20[%81, %c0_55] : memref<64x32xf32, #tpu.memory_space<vmem>>, vector<8x32xf32>
    %83 = arith.index_cast %80 : i32 to index
    %c0_56 = arith.constant 0 : index
    %84 = vector.load %arg21[%83, %c0_56] : memref<64x32xf32, #tpu.memory_space<vmem>>, vector<8x32xf32>
    %85 = arith.index_cast %80 : i32 to index
    %c0_57 = arith.constant 0 : index
    %86 = vector.load %arg22[%85, %c0_57] : memref<64x32xf32, #tpu.memory_space<vmem>>, vector<8x32xf32>
    %cst_58 = arith.constant dense<0.000000e+00> : vector<8x32xf32>
    %87 = tpu.matmul %78, %35, %cst_58 {dimension_numbers = #tpu.dot_dimension_numbers<[1], [0], [0], [1], [0, 0, 1, 1], [], []>} : vector<8x32xf32>, vector<32x32xf32>, vector<8x32xf32> -> vector<8x32xf32>
    %88 = vector.broadcast %38 : vector<1x32xf32> to vector<8x32xf32>
    %89 = arith.addf %87, %88 : vector<8x32xf32>
    %cst_59 = arith.constant dense<0.000000e+00> : vector<8x32xf32>
    %90 = tpu.matmul %78, %36, %cst_59 {dimension_numbers = #tpu.dot_dimension_numbers<[1], [0], [0], [1], [0, 0, 1, 1], [], []>} : vector<8x32xf32>, vector<32x32xf32>, vector<8x32xf32> -> vector<8x32xf32>
    %91 = vector.broadcast %39 : vector<1x32xf32> to vector<8x32xf32>
    %92 = arith.addf %90, %91 : vector<8x32xf32>
    %cst_60 = arith.constant dense<0.000000e+00> : vector<8x32xf32>
    %93 = tpu.matmul %78, %37, %cst_60 {dimension_numbers = #tpu.dot_dimension_numbers<[1], [0], [0], [1], [0, 0, 1, 1], [], []>} : vector<8x32xf32>, vector<32x32xf32>, vector<8x32xf32> -> vector<8x32xf32>
    %94 = vector.broadcast %40 : vector<1x32xf32> to vector<8x32xf32>
    %95 = arith.addf %93, %94 : vector<8x32xf32>
    %96 = arith.addf %82, %89 : vector<8x32xf32>
    %97 = arith.negf %96 : vector<8x32xf32>
    %98 = math.exp %97 : vector<8x32xf32>
    %cst_61 = arith.constant 1.000000e+00 : f32
    %99 = vector.broadcast %cst_61 : f32 to vector<8x32xf32>
    %100 = arith.addf %99, %98 : vector<8x32xf32>
    %101 = arith.divf %99, %100 : vector<8x32xf32>
    %102 = arith.addf %84, %92 : vector<8x32xf32>
    %103 = arith.negf %102 : vector<8x32xf32>
    %104 = math.exp %103 : vector<8x32xf32>
    %cst_62 = arith.constant 1.000000e+00 : f32
    %105 = vector.broadcast %cst_62 : f32 to vector<8x32xf32>
    %106 = arith.addf %105, %104 : vector<8x32xf32>
    %107 = arith.divf %105, %106 : vector<8x32xf32>
    %108 = arith.mulf %101, %95 : vector<8x32xf32>
    %109 = arith.addf %86, %108 : vector<8x32xf32>
    %110 = math.tanh %109 : vector<8x32xf32>
    %cst_63 = arith.constant 1.000000e+00 : f32
    %111 = vector.broadcast %cst_63 : f32 to vector<8x32xf32>
    %112 = arith.subf %111, %107 : vector<8x32xf32>
    %113 = arith.mulf %112, %110 : vector<8x32xf32>
    %114 = arith.mulf %107, %78 : vector<8x32xf32>
    %115 = arith.addf %113, %114 : vector<8x32xf32>
    %c2_i32 = arith.constant 2 : i32
    %c8_i32_64 = arith.constant 8 : i32
    %116 = arith.muli %c2_i32, %c8_i32_64 : i32
    %117 = tpu.assume_multiple %116, 8 : i32
    %118 = arith.index_cast %117 : i32 to index
    %c0_65 = arith.constant 0 : index
    %119 = vector.load %arg20[%118, %c0_65] : memref<64x32xf32, #tpu.memory_space<vmem>>, vector<8x32xf32>
    %120 = arith.index_cast %117 : i32 to index
    %c0_66 = arith.constant 0 : index
    %121 = vector.load %arg21[%120, %c0_66] : memref<64x32xf32, #tpu.memory_space<vmem>>, vector<8x32xf32>
    %122 = arith.index_cast %117 : i32 to index
    %c0_67 = arith.constant 0 : index
    %123 = vector.load %arg22[%122, %c0_67] : memref<64x32xf32, #tpu.memory_space<vmem>>, vector<8x32xf32>
    %cst_68 = arith.constant dense<0.000000e+00> : vector<8x32xf32>
    %124 = tpu.matmul %115, %35, %cst_68 {dimension_numbers = #tpu.dot_dimension_numbers<[1], [0], [0], [1], [0, 0, 1, 1], [], []>} : vector<8x32xf32>, vector<32x32xf32>, vector<8x32xf32> -> vector<8x32xf32>
    %125 = vector.broadcast %38 : vector<1x32xf32> to vector<8x32xf32>
    %126 = arith.addf %124, %125 : vector<8x32xf32>
    %cst_69 = arith.constant dense<0.000000e+00> : vector<8x32xf32>
    %127 = tpu.matmul %115, %36, %cst_69 {dimension_numbers = #tpu.dot_dimension_numbers<[1], [0], [0], [1], [0, 0, 1, 1], [], []>} : vector<8x32xf32>, vector<32x32xf32>, vector<8x32xf32> -> vector<8x32xf32>
    %128 = vector.broadcast %39 : vector<1x32xf32> to vector<8x32xf32>
    %129 = arith.addf %127, %128 : vector<8x32xf32>
    %cst_70 = arith.constant dense<0.000000e+00> : vector<8x32xf32>
    %130 = tpu.matmul %115, %37, %cst_70 {dimension_numbers = #tpu.dot_dimension_numbers<[1], [0], [0], [1], [0, 0, 1, 1], [], []>} : vector<8x32xf32>, vector<32x32xf32>, vector<8x32xf32> -> vector<8x32xf32>
    %131 = vector.broadcast %40 : vector<1x32xf32> to vector<8x32xf32>
    %132 = arith.addf %130, %131 : vector<8x32xf32>
    %133 = arith.addf %119, %126 : vector<8x32xf32>
    %134 = arith.negf %133 : vector<8x32xf32>
    %135 = math.exp %134 : vector<8x32xf32>
    %cst_71 = arith.constant 1.000000e+00 : f32
    %136 = vector.broadcast %cst_71 : f32 to vector<8x32xf32>
    %137 = arith.addf %136, %135 : vector<8x32xf32>
    %138 = arith.divf %136, %137 : vector<8x32xf32>
    %139 = arith.addf %121, %129 : vector<8x32xf32>
    %140 = arith.negf %139 : vector<8x32xf32>
    %141 = math.exp %140 : vector<8x32xf32>
    %cst_72 = arith.constant 1.000000e+00 : f32
    %142 = vector.broadcast %cst_72 : f32 to vector<8x32xf32>
    %143 = arith.addf %142, %141 : vector<8x32xf32>
    %144 = arith.divf %142, %143 : vector<8x32xf32>
    %145 = arith.mulf %138, %132 : vector<8x32xf32>
    %146 = arith.addf %123, %145 : vector<8x32xf32>
    %147 = math.tanh %146 : vector<8x32xf32>
    %cst_73 = arith.constant 1.000000e+00 : f32
    %148 = vector.broadcast %cst_73 : f32 to vector<8x32xf32>
    %149 = arith.subf %148, %144 : vector<8x32xf32>
    %150 = arith.mulf %149, %147 : vector<8x32xf32>
    %151 = arith.mulf %144, %115 : vector<8x32xf32>
    %152 = arith.addf %150, %151 : vector<8x32xf32>
    %c3_i32 = arith.constant 3 : i32
    %c8_i32_74 = arith.constant 8 : i32
    %153 = arith.muli %c3_i32, %c8_i32_74 : i32
    %154 = tpu.assume_multiple %153, 8 : i32
    %155 = arith.index_cast %154 : i32 to index
    %c0_75 = arith.constant 0 : index
    %156 = vector.load %arg20[%155, %c0_75] : memref<64x32xf32, #tpu.memory_space<vmem>>, vector<8x32xf32>
    %157 = arith.index_cast %154 : i32 to index
    %c0_76 = arith.constant 0 : index
    %158 = vector.load %arg21[%157, %c0_76] : memref<64x32xf32, #tpu.memory_space<vmem>>, vector<8x32xf32>
    %159 = arith.index_cast %154 : i32 to index
    %c0_77 = arith.constant 0 : index
    %160 = vector.load %arg22[%159, %c0_77] : memref<64x32xf32, #tpu.memory_space<vmem>>, vector<8x32xf32>
    %cst_78 = arith.constant dense<0.000000e+00> : vector<8x32xf32>
    %161 = tpu.matmul %152, %35, %cst_78 {dimension_numbers = #tpu.dot_dimension_numbers<[1], [0], [0], [1], [0, 0, 1, 1], [], []>} : vector<8x32xf32>, vector<32x32xf32>, vector<8x32xf32> -> vector<8x32xf32>
    %162 = vector.broadcast %38 : vector<1x32xf32> to vector<8x32xf32>
    %163 = arith.addf %161, %162 : vector<8x32xf32>
    %cst_79 = arith.constant dense<0.000000e+00> : vector<8x32xf32>
    %164 = tpu.matmul %152, %36, %cst_79 {dimension_numbers = #tpu.dot_dimension_numbers<[1], [0], [0], [1], [0, 0, 1, 1], [], []>} : vector<8x32xf32>, vector<32x32xf32>, vector<8x32xf32> -> vector<8x32xf32>
    %165 = vector.broadcast %39 : vector<1x32xf32> to vector<8x32xf32>
    %166 = arith.addf %164, %165 : vector<8x32xf32>
    %cst_80 = arith.constant dense<0.000000e+00> : vector<8x32xf32>
    %167 = tpu.matmul %152, %37, %cst_80 {dimension_numbers = #tpu.dot_dimension_numbers<[1], [0], [0], [1], [0, 0, 1, 1], [], []>} : vector<8x32xf32>, vector<32x32xf32>, vector<8x32xf32> -> vector<8x32xf32>
    %168 = vector.broadcast %40 : vector<1x32xf32> to vector<8x32xf32>
    %169 = arith.addf %167, %168 : vector<8x32xf32>
    %170 = arith.addf %156, %163 : vector<8x32xf32>
    %171 = arith.negf %170 : vector<8x32xf32>
    %172 = math.exp %171 : vector<8x32xf32>
    %cst_81 = arith.constant 1.000000e+00 : f32
    %173 = vector.broadcast %cst_81 : f32 to vector<8x32xf32>
    %174 = arith.addf %173, %172 : vector<8x32xf32>
    %175 = arith.divf %173, %174 : vector<8x32xf32>
    %176 = arith.addf %158, %166 : vector<8x32xf32>
    %177 = arith.negf %176 : vector<8x32xf32>
    %178 = math.exp %177 : vector<8x32xf32>
    %cst_82 = arith.constant 1.000000e+00 : f32
    %179 = vector.broadcast %cst_82 : f32 to vector<8x32xf32>
    %180 = arith.addf %179, %178 : vector<8x32xf32>
    %181 = arith.divf %179, %180 : vector<8x32xf32>
    %182 = arith.mulf %175, %169 : vector<8x32xf32>
    %183 = arith.addf %160, %182 : vector<8x32xf32>
    %184 = math.tanh %183 : vector<8x32xf32>
    %cst_83 = arith.constant 1.000000e+00 : f32
    %185 = vector.broadcast %cst_83 : f32 to vector<8x32xf32>
    %186 = arith.subf %185, %181 : vector<8x32xf32>
    %187 = arith.mulf %186, %184 : vector<8x32xf32>
    %188 = arith.mulf %181, %152 : vector<8x32xf32>
    %189 = arith.addf %187, %188 : vector<8x32xf32>
    %c4_i32 = arith.constant 4 : i32
    %c8_i32_84 = arith.constant 8 : i32
    %190 = arith.muli %c4_i32, %c8_i32_84 : i32
    %191 = tpu.assume_multiple %190, 8 : i32
    %192 = arith.index_cast %191 : i32 to index
    %c0_85 = arith.constant 0 : index
    %193 = vector.load %arg20[%192, %c0_85] : memref<64x32xf32, #tpu.memory_space<vmem>>, vector<8x32xf32>
    %194 = arith.index_cast %191 : i32 to index
    %c0_86 = arith.constant 0 : index
    %195 = vector.load %arg21[%194, %c0_86] : memref<64x32xf32, #tpu.memory_space<vmem>>, vector<8x32xf32>
    %196 = arith.index_cast %191 : i32 to index
    %c0_87 = arith.constant 0 : index
    %197 = vector.load %arg22[%196, %c0_87] : memref<64x32xf32, #tpu.memory_space<vmem>>, vector<8x32xf32>
    %cst_88 = arith.constant dense<0.000000e+00> : vector<8x32xf32>
    %198 = tpu.matmul %189, %35, %cst_88 {dimension_numbers = #tpu.dot_dimension_numbers<[1], [0], [0], [1], [0, 0, 1, 1], [], []>} : vector<8x32xf32>, vector<32x32xf32>, vector<8x32xf32> -> vector<8x32xf32>
    %199 = vector.broadcast %38 : vector<1x32xf32> to vector<8x32xf32>
    %200 = arith.addf %198, %199 : vector<8x32xf32>
    %cst_89 = arith.constant dense<0.000000e+00> : vector<8x32xf32>
    %201 = tpu.matmul %189, %36, %cst_89 {dimension_numbers = #tpu.dot_dimension_numbers<[1], [0], [0], [1], [0, 0, 1, 1], [], []>} : vector<8x32xf32>, vector<32x32xf32>, vector<8x32xf32> -> vector<8x32xf32>
    %202 = vector.broadcast %39 : vector<1x32xf32> to vector<8x32xf32>
    %203 = arith.addf %201, %202 : vector<8x32xf32>
    %cst_90 = arith.constant dense<0.000000e+00> : vector<8x32xf32>
    %204 = tpu.matmul %189, %37, %cst_90 {dimension_numbers = #tpu.dot_dimension_numbers<[1], [0], [0], [1], [0, 0, 1, 1], [], []>} : vector<8x32xf32>, vector<32x32xf32>, vector<8x32xf32> -> vector<8x32xf32>
    %205 = vector.broadcast %40 : vector<1x32xf32> to vector<8x32xf32>
    %206 = arith.addf %204, %205 : vector<8x32xf32>
    %207 = arith.addf %193, %200 : vector<8x32xf32>
    %208 = arith.negf %207 : vector<8x32xf32>
    %209 = math.exp %208 : vector<8x32xf32>
    %cst_91 = arith.constant 1.000000e+00 : f32
    %210 = vector.broadcast %cst_91 : f32 to vector<8x32xf32>
    %211 = arith.addf %210, %209 : vector<8x32xf32>
    %212 = arith.divf %210, %211 : vector<8x32xf32>
    %213 = arith.addf %195, %203 : vector<8x32xf32>
    %214 = arith.negf %213 : vector<8x32xf32>
    %215 = math.exp %214 : vector<8x32xf32>
    %cst_92 = arith.constant 1.000000e+00 : f32
    %216 = vector.broadcast %cst_92 : f32 to vector<8x32xf32>
    %217 = arith.addf %216, %215 : vector<8x32xf32>
    %218 = arith.divf %216, %217 : vector<8x32xf32>
    %219 = arith.mulf %212, %206 : vector<8x32xf32>
    %220 = arith.addf %197, %219 : vector<8x32xf32>
    %221 = math.tanh %220 : vector<8x32xf32>
    %cst_93 = arith.constant 1.000000e+00 : f32
    %222 = vector.broadcast %cst_93 : f32 to vector<8x32xf32>
    %223 = arith.subf %222, %218 : vector<8x32xf32>
    %224 = arith.mulf %223, %221 : vector<8x32xf32>
    %225 = arith.mulf %218, %189 : vector<8x32xf32>
    %226 = arith.addf %224, %225 : vector<8x32xf32>
    %c5_i32 = arith.constant 5 : i32
    %c8_i32_94 = arith.constant 8 : i32
    %227 = arith.muli %c5_i32, %c8_i32_94 : i32
    %228 = tpu.assume_multiple %227, 8 : i32
    %229 = arith.index_cast %228 : i32 to index
    %c0_95 = arith.constant 0 : index
    %230 = vector.load %arg20[%229, %c0_95] : memref<64x32xf32, #tpu.memory_space<vmem>>, vector<8x32xf32>
    %231 = arith.index_cast %228 : i32 to index
    %c0_96 = arith.constant 0 : index
    %232 = vector.load %arg21[%231, %c0_96] : memref<64x32xf32, #tpu.memory_space<vmem>>, vector<8x32xf32>
    %233 = arith.index_cast %228 : i32 to index
    %c0_97 = arith.constant 0 : index
    %234 = vector.load %arg22[%233, %c0_97] : memref<64x32xf32, #tpu.memory_space<vmem>>, vector<8x32xf32>
    %cst_98 = arith.constant dense<0.000000e+00> : vector<8x32xf32>
    %235 = tpu.matmul %226, %35, %cst_98 {dimension_numbers = #tpu.dot_dimension_numbers<[1], [0], [0], [1], [0, 0, 1, 1], [], []>} : vector<8x32xf32>, vector<32x32xf32>, vector<8x32xf32> -> vector<8x32xf32>
    %236 = vector.broadcast %38 : vector<1x32xf32> to vector<8x32xf32>
    %237 = arith.addf %235, %236 : vector<8x32xf32>
    %cst_99 = arith.constant dense<0.000000e+00> : vector<8x32xf32>
    %238 = tpu.matmul %226, %36, %cst_99 {dimension_numbers = #tpu.dot_dimension_numbers<[1], [0], [0], [1], [0, 0, 1, 1], [], []>} : vector<8x32xf32>, vector<32x32xf32>, vector<8x32xf32> -> vector<8x32xf32>
    %239 = vector.broadcast %39 : vector<1x32xf32> to vector<8x32xf32>
    %240 = arith.addf %238, %239 : vector<8x32xf32>
    %cst_100 = arith.constant dense<0.000000e+00> : vector<8x32xf32>
    %241 = tpu.matmul %226, %37, %cst_100 {dimension_numbers = #tpu.dot_dimension_numbers<[1], [0], [0], [1], [0, 0, 1, 1], [], []>} : vector<8x32xf32>, vector<32x32xf32>, vector<8x32xf32> -> vector<8x32xf32>
    %242 = vector.broadcast %40 : vector<1x32xf32> to vector<8x32xf32>
    %243 = arith.addf %241, %242 : vector<8x32xf32>
    %244 = arith.addf %230, %237 : vector<8x32xf32>
    %245 = arith.negf %244 : vector<8x32xf32>
    %246 = math.exp %245 : vector<8x32xf32>
    %cst_101 = arith.constant 1.000000e+00 : f32
    %247 = vector.broadcast %cst_101 : f32 to vector<8x32xf32>
    %248 = arith.addf %247, %246 : vector<8x32xf32>
    %249 = arith.divf %247, %248 : vector<8x32xf32>
    %250 = arith.addf %232, %240 : vector<8x32xf32>
    %251 = arith.negf %250 : vector<8x32xf32>
    %252 = math.exp %251 : vector<8x32xf32>
    %cst_102 = arith.constant 1.000000e+00 : f32
    %253 = vector.broadcast %cst_102 : f32 to vector<8x32xf32>
    %254 = arith.addf %253, %252 : vector<8x32xf32>
    %255 = arith.divf %253, %254 : vector<8x32xf32>
    %256 = arith.mulf %249, %243 : vector<8x32xf32>
    %257 = arith.addf %234, %256 : vector<8x32xf32>
    %258 = math.tanh %257 : vector<8x32xf32>
    %cst_103 = arith.constant 1.000000e+00 : f32
    %259 = vector.broadcast %cst_103 : f32 to vector<8x32xf32>
    %260 = arith.subf %259, %255 : vector<8x32xf32>
    %261 = arith.mulf %260, %258 : vector<8x32xf32>
    %262 = arith.mulf %255, %226 : vector<8x32xf32>
    %263 = arith.addf %261, %262 : vector<8x32xf32>
    %c6_i32 = arith.constant 6 : i32
    %c8_i32_104 = arith.constant 8 : i32
    %264 = arith.muli %c6_i32, %c8_i32_104 : i32
    %265 = tpu.assume_multiple %264, 8 : i32
    %266 = arith.index_cast %265 : i32 to index
    %c0_105 = arith.constant 0 : index
    %267 = vector.load %arg20[%266, %c0_105] : memref<64x32xf32, #tpu.memory_space<vmem>>, vector<8x32xf32>
    %268 = arith.index_cast %265 : i32 to index
    %c0_106 = arith.constant 0 : index
    %269 = vector.load %arg21[%268, %c0_106] : memref<64x32xf32, #tpu.memory_space<vmem>>, vector<8x32xf32>
    %270 = arith.index_cast %265 : i32 to index
    %c0_107 = arith.constant 0 : index
    %271 = vector.load %arg22[%270, %c0_107] : memref<64x32xf32, #tpu.memory_space<vmem>>, vector<8x32xf32>
    %cst_108 = arith.constant dense<0.000000e+00> : vector<8x32xf32>
    %272 = tpu.matmul %263, %35, %cst_108 {dimension_numbers = #tpu.dot_dimension_numbers<[1], [0], [0], [1], [0, 0, 1, 1], [], []>} : vector<8x32xf32>, vector<32x32xf32>, vector<8x32xf32> -> vector<8x32xf32>
    %273 = vector.broadcast %38 : vector<1x32xf32> to vector<8x32xf32>
    %274 = arith.addf %272, %273 : vector<8x32xf32>
    %cst_109 = arith.constant dense<0.000000e+00> : vector<8x32xf32>
    %275 = tpu.matmul %263, %36, %cst_109 {dimension_numbers = #tpu.dot_dimension_numbers<[1], [0], [0], [1], [0, 0, 1, 1], [], []>} : vector<8x32xf32>, vector<32x32xf32>, vector<8x32xf32> -> vector<8x32xf32>
    %276 = vector.broadcast %39 : vector<1x32xf32> to vector<8x32xf32>
    %277 = arith.addf %275, %276 : vector<8x32xf32>
    %cst_110 = arith.constant dense<0.000000e+00> : vector<8x32xf32>
    %278 = tpu.matmul %263, %37, %cst_110 {dimension_numbers = #tpu.dot_dimension_numbers<[1], [0], [0], [1], [0, 0, 1, 1], [], []>} : vector<8x32xf32>, vector<32x32xf32>, vector<8x32xf32> -> vector<8x32xf32>
    %279 = vector.broadcast %40 : vector<1x32xf32> to vector<8x32xf32>
    %280 = arith.addf %278, %279 : vector<8x32xf32>
    %281 = arith.addf %267, %274 : vector<8x32xf32>
    %282 = arith.negf %281 : vector<8x32xf32>
    %283 = math.exp %282 : vector<8x32xf32>
    %cst_111 = arith.constant 1.000000e+00 : f32
    %284 = vector.broadcast %cst_111 : f32 to vector<8x32xf32>
    %285 = arith.addf %284, %283 : vector<8x32xf32>
    %286 = arith.divf %284, %285 : vector<8x32xf32>
    %287 = arith.addf %269, %277 : vector<8x32xf32>
    %288 = arith.negf %287 : vector<8x32xf32>
    %289 = math.exp %288 : vector<8x32xf32>
    %cst_112 = arith.constant 1.000000e+00 : f32
    %290 = vector.broadcast %cst_112 : f32 to vector<8x32xf32>
    %291 = arith.addf %290, %289 : vector<8x32xf32>
    %292 = arith.divf %290, %291 : vector<8x32xf32>
    %293 = arith.mulf %286, %280 : vector<8x32xf32>
    %294 = arith.addf %271, %293 : vector<8x32xf32>
    %295 = math.tanh %294 : vector<8x32xf32>
    %cst_113 = arith.constant 1.000000e+00 : f32
    %296 = vector.broadcast %cst_113 : f32 to vector<8x32xf32>
    %297 = arith.subf %296, %292 : vector<8x32xf32>
    %298 = arith.mulf %297, %295 : vector<8x32xf32>
    %299 = arith.mulf %292, %263 : vector<8x32xf32>
    %300 = arith.addf %298, %299 : vector<8x32xf32>
    %c7_i32 = arith.constant 7 : i32
    %c8_i32_114 = arith.constant 8 : i32
    %301 = arith.muli %c7_i32, %c8_i32_114 : i32
    %302 = tpu.assume_multiple %301, 8 : i32
    %303 = arith.index_cast %302 : i32 to index
    %c0_115 = arith.constant 0 : index
    %304 = vector.load %arg20[%303, %c0_115] : memref<64x32xf32, #tpu.memory_space<vmem>>, vector<8x32xf32>
    %305 = arith.index_cast %302 : i32 to index
    %c0_116 = arith.constant 0 : index
    %306 = vector.load %arg21[%305, %c0_116] : memref<64x32xf32, #tpu.memory_space<vmem>>, vector<8x32xf32>
    %307 = arith.index_cast %302 : i32 to index
    %c0_117 = arith.constant 0 : index
    %308 = vector.load %arg22[%307, %c0_117] : memref<64x32xf32, #tpu.memory_space<vmem>>, vector<8x32xf32>
    %cst_118 = arith.constant dense<0.000000e+00> : vector<8x32xf32>
    %309 = tpu.matmul %300, %35, %cst_118 {dimension_numbers = #tpu.dot_dimension_numbers<[1], [0], [0], [1], [0, 0, 1, 1], [], []>} : vector<8x32xf32>, vector<32x32xf32>, vector<8x32xf32> -> vector<8x32xf32>
    %310 = vector.broadcast %38 : vector<1x32xf32> to vector<8x32xf32>
    %311 = arith.addf %309, %310 : vector<8x32xf32>
    %cst_119 = arith.constant dense<0.000000e+00> : vector<8x32xf32>
    %312 = tpu.matmul %300, %36, %cst_119 {dimension_numbers = #tpu.dot_dimension_numbers<[1], [0], [0], [1], [0, 0, 1, 1], [], []>} : vector<8x32xf32>, vector<32x32xf32>, vector<8x32xf32> -> vector<8x32xf32>
    %313 = vector.broadcast %39 : vector<1x32xf32> to vector<8x32xf32>
    %314 = arith.addf %312, %313 : vector<8x32xf32>
    %cst_120 = arith.constant dense<0.000000e+00> : vector<8x32xf32>
    %315 = tpu.matmul %300, %37, %cst_120 {dimension_numbers = #tpu.dot_dimension_numbers<[1], [0], [0], [1], [0, 0, 1, 1], [], []>} : vector<8x32xf32>, vector<32x32xf32>, vector<8x32xf32> -> vector<8x32xf32>
    %316 = vector.broadcast %40 : vector<1x32xf32> to vector<8x32xf32>
    %317 = arith.addf %315, %316 : vector<8x32xf32>
    %318 = arith.addf %304, %311 : vector<8x32xf32>
    %319 = arith.negf %318 : vector<8x32xf32>
    %320 = math.exp %319 : vector<8x32xf32>
    %cst_121 = arith.constant 1.000000e+00 : f32
    %321 = vector.broadcast %cst_121 : f32 to vector<8x32xf32>
    %322 = arith.addf %321, %320 : vector<8x32xf32>
    %323 = arith.divf %321, %322 : vector<8x32xf32>
    %324 = arith.addf %306, %314 : vector<8x32xf32>
    %325 = arith.negf %324 : vector<8x32xf32>
    %326 = math.exp %325 : vector<8x32xf32>
    %cst_122 = arith.constant 1.000000e+00 : f32
    %327 = vector.broadcast %cst_122 : f32 to vector<8x32xf32>
    %328 = arith.addf %327, %326 : vector<8x32xf32>
    %329 = arith.divf %327, %328 : vector<8x32xf32>
    %330 = arith.mulf %323, %317 : vector<8x32xf32>
    %331 = arith.addf %308, %330 : vector<8x32xf32>
    %332 = math.tanh %331 : vector<8x32xf32>
    %cst_123 = arith.constant 1.000000e+00 : f32
    %333 = vector.broadcast %cst_123 : f32 to vector<8x32xf32>
    %334 = arith.subf %333, %329 : vector<8x32xf32>
    %335 = arith.mulf %334, %332 : vector<8x32xf32>
    %336 = arith.mulf %329, %300 : vector<8x32xf32>
    %337 = arith.addf %335, %336 : vector<8x32xf32>
    %c8_i32_124 = arith.constant 8 : i32
    %c0_125 = arith.constant 0 : index
    %c0_126 = arith.constant 0 : index
    %338 = vector.load %arg17[%c0_125, %c0_126] : memref<32x128xf32, #tpu.memory_space<vmem>>, vector<32x128xf32>
    %cst_127 = arith.constant dense<0.000000e+00> : vector<8x128xf32>
    %339 = tpu.matmul %337, %338, %cst_127 {dimension_numbers = #tpu.dot_dimension_numbers<[1], [0], [0], [1], [0, 0, 1, 1], [], []>} : vector<8x32xf32>, vector<32x128xf32>, vector<8x128xf32> -> vector<8x128xf32>
    %c0_128 = arith.constant 0 : index
    %c0_129 = arith.constant 0 : index
    %340 = vector.load %arg18[%c0_128, %c0_129] : memref<1x128xf32, #tpu.memory_space<vmem>>, vector<1x128xf32>
    %341 = vector.broadcast %340 : vector<1x128xf32> to vector<8x128xf32>
    %342 = arith.addf %339, %341 : vector<8x128xf32>
    %c0_130 = arith.constant 0 : index
    %c0_131 = arith.constant 0 : index
    %343 = vector.load %arg19[%c0_130, %c0_131] : memref<8x128xf32, #tpu.memory_space<vmem>>, vector<8x128xf32>
    tpu.vector_store %arg19[%c0_130, %c0_131], %342 {strides = array<i32>} : memref<8x128xf32, #tpu.memory_space<vmem>>, vector<8x128xf32>,
    return
  }
  func.func @transform_0(%arg0: i32) -> (i32, i32) {
    %c0_i32 = arith.constant 0 : i32
    %c0_i32_0 = arith.constant 0 : i32
    %c0_i32_1 = arith.constant 0 : i32
    return %c0_i32, %c0_i32_0 : i32, i32
  }
  func.func @transform_1(%arg0: i32) -> (i32, i32) {
    %c0_i32 = arith.constant 0 : i32
    %c0_i32_0 = arith.constant 0 : i32
    %c0_i32_1 = arith.constant 0 : i32
    return %c0_i32, %c0_i32_0 : i32, i32
  }
  func.func @transform_2(%arg0: i32) -> (i32, i32) {
    %c0_i32 = arith.constant 0 : i32
    %c0_i32_0 = arith.constant 0 : i32
    %c0_i32_1 = arith.constant 0 : i32
    return %c0_i32, %c0_i32_0 : i32, i32
  }
  func.func @transform_3(%arg0: i32) -> (i32, i32) {
    %c0_i32 = arith.constant 0 : i32
    %c0_i32_0 = arith.constant 0 : i32
    %c0_i32_1 = arith.constant 0 : i32
    return %c0_i32, %c0_i32_0 : i32, i32
  }
  func.func @transform_4(%arg0: i32) -> (i32, i32) {
    %c0_i32 = arith.constant 0 : i32
    %c0_i32_0 = arith.constant 0 : i32
    %c0_i32_1 = arith.constant 0 : i32
    return %c0_i32, %c0_i32_0 : i32, i32
  }
  func.func @transform_5(%arg0: i32) -> (i32, i32) {
    %c0_i32 = arith.constant 0 : i32
    %c0_i32_0 = arith.constant 0 : i32
    %c0_i32_1 = arith.constant 0 : i32
    return %c0_i32, %c0_i32_0 : i32, i32
  }
  func.func @transform_6(%arg0: i32) -> (i32, i32) {
    %c0_i32 = arith.constant 0 : i32
    %c0_i32_0 = arith.constant 0 : i32
    %c0_i32_1 = arith.constant 0 : i32
    return %c0_i32, %c0_i32_0 : i32, i32
  }
  func.func @transform_7(%arg0: i32) -> (i32, i32) {
    %c0_i32 = arith.constant 0 : i32
    %c0_i32_0 = arith.constant 0 : i32
    %c0_i32_1 = arith.constant 0 : i32
    return %c0_i32, %c0_i32_0 : i32, i32
  }
  func.func @transform_8(%arg0: i32) -> (i32, i32) {
    %c0_i32 = arith.constant 0 : i32
    %c0_i32_0 = arith.constant 0 : i32
    %c0_i32_1 = arith.constant 0 : i32
    return %c0_i32, %c0_i32_0 : i32, i32
  }
  func.func @transform_9(%arg0: i32) -> (i32, i32) {
    %c0_i32 = arith.constant 0 : i32
    %c0_i32_0 = arith.constant 0 : i32
    %c0_i32_1 = arith.constant 0 : i32
    return %c0_i32, %c0_i32_0 : i32, i32
  }
  func.func @transform_10(%arg0: i32) -> (i32, i32) {
    %c0_i32 = arith.constant 0 : i32
    %c0_i32_0 = arith.constant 0 : i32
    %c0_i32_1 = arith.constant 0 : i32
    return %c0_i32, %c0_i32_0 : i32, i32
  }
  func.func @transform_11(%arg0: i32) -> (i32, i32) {
    %c0_i32 = arith.constant 0 : i32
    %c0_i32_0 = arith.constant 0 : i32
    %c0_i32_1 = arith.constant 0 : i32
    return %c0_i32, %c0_i32_0 : i32, i32
  }
  func.func @transform_12(%arg0: i32) -> (i32, i32) {
    %c0_i32 = arith.constant 0 : i32
    %c0_i32_0 = arith.constant 0 : i32
    %c0_i32_1 = arith.constant 0 : i32
    return %c0_i32, %c0_i32_0 : i32, i32
  }
  func.func @transform_13(%arg0: i32) -> (i32, i32) {
    %c0_i32 = arith.constant 0 : i32
    %c0_i32_0 = arith.constant 0 : i32
    %c0_i32_1 = arith.constant 0 : i32
    return %c0_i32, %c0_i32_0 : i32, i32
  }
  func.func @transform_14(%arg0: i32) -> (i32, i32) {
    %c0_i32 = arith.constant 0 : i32
    %c0_i32_0 = arith.constant 0 : i32
    %c0_i32_1 = arith.constant 0 : i32
    return %c0_i32, %c0_i32_0 : i32, i32
  }
  func.func @transform_15(%arg0: i32) -> (i32, i32) {
    %c0_i32 = arith.constant 0 : i32
    %c0_i32_0 = arith.constant 0 : i32
    %c0_i32_1 = arith.constant 0 : i32
    return %c0_i32, %c0_i32_0 : i32, i32
  }
  func.func @transform_16(%arg0: i32) -> (i32, i32) {
    %c0_i32 = arith.constant 0 : i32
    %c0_i32_0 = arith.constant 0 : i32
    %c0_i32_1 = arith.constant 0 : i32
    return %c0_i32, %c0_i32_0 : i32, i32
  }
  func.func @transform_17(%arg0: i32) -> (i32, i32) {
    %c0_i32 = arith.constant 0 : i32
    %c0_i32_0 = arith.constant 0 : i32
    %c0_i32_1 = arith.constant 0 : i32
    return %c0_i32, %c0_i32_0 : i32, i32
  }
  func.func @transform_18(%arg0: i32) -> (i32, i32) {
    %c0_i32 = arith.constant 0 : i32
    %c0_i32_0 = arith.constant 0 : i32
    %c0_i32_1 = arith.constant 0 : i32
    return %c0_i32, %c0_i32_0 : i32, i32
  }
}

</mosaic_0001>

<bundles_post_ra>
// kernel: tpu_custom_call.1
= control target key start
LH: loop header
LB: loop body
LE: loop exit
PB: predicated region body
PF: predicated region fallthrough
CT: control target
= control target key end

     0   :  { %s4231_s0 = inlined_call_operand.vmem [shape: f32[64,32], index: 0, kind: input, shape index: {}]   ;;  %s4232_s1 = inlined_call_operand.vmem [shape: f32[1,32], index: 1, kind: input, shape index: {}]   ;;  %s4233_s2 = inlined_call_operand.vmem [shape: f32[32,16], index: 2, kind: input, shape index: {}]   ;;  %s4234_s3 = inlined_call_operand.vmem [shape: f32[1,16], index: 3, kind: input, shape index: {}]   ;;  %s4235_s4 = inlined_call_operand.hbm [shape: f32[16,32], index: 4, kind: input, shape index: {}]   ;;  %s4236_s5 = inlined_call_operand.hbm [shape: f32[16,32], index: 5, kind: input, shape index: {}]   ;;  %s4237_s6 = inlined_call_operand.hbm [shape: f32[16,32], index: 6, kind: input, shape index: {}]   ;;  %s4238_s7 = inlined_call_operand.vmem [shape: f32[1,32], index: 7, kind: input, shape index: {}]   ;;  %s4239_s8 = inlined_call_operand.vmem [shape: f32[1,32], index: 8, kind: input, shape index: {}]   ;;  %s4240_s9 = inlined_call_operand.vmem [shape: f32[1,32], index: 9, kind: input, shape index: {}]   ;;  %s4241_s10 = inlined_call_operand.vmem [shape: f32[32,32], index: 10, kind: input, shape index: {}]   ;;  %s4242_s11 = inlined_call_operand.vmem [shape: f32[32,32], index: 11, kind: input, shape index: {}]   ;;  %s4243_s12 = inlined_call_operand.vmem [shape: f32[32,32], index: 12, kind: input, shape index: {}]   ;;  %s4244_s13 = inlined_call_operand.vmem [shape: f32[1,32], index: 13, kind: input, shape index: {}]   ;;  %s4245_s14 = inlined_call_operand.vmem [shape: f32[1,32], index: 14, kind: input, shape index: {}]   ;;  %s4246_s15 = inlined_call_operand.vmem [shape: f32[1,32], index: 15, kind: input, shape index: {}]   ;;  %s4247_s16 = inlined_call_operand.vmem [shape: f32[32,128], index: 16, kind: input, shape index: {}]   ;;  %s4248_s17 = inlined_call_operand.vmem [shape: f32[1,128], index: 17, kind: input, shape index: {}]   ;;  %s4249_s18 = inlined_call_operand.hbm [shape: f32[8,128], index: 18, kind: output, shape index: {}]  }
   0x1   :  { %4252 = sst [smem:[#allocation15_spill]] %s4231_s0 }
   0x2   :  { %4253 = sst [smem:[#allocation16_spill]] %s4232_s1 }
   0x3   :  { %4254 = sst [smem:[#allocation17_spill]] %s4233_s2 }
   0x4   :  { %23 = vsyncpa [#allocation6], 0 }
   0x5   :  { %24 = vsyncpa [#allocation9], 0 }
   0x6   :  { %25 = vsyncpa [#allocation7], 0  ;;  %s3681_s27 = smov [#allocation8]   ;;  %s3682_s29 = smov [#allocation5]  }
   0x7   :  { %s51_s28 = sshll.u32 %s3681_s27, 4  ;;  %s39_s30 = sshll.u32 %s3682_s29, 4  ;;  %s52_s28 = int_to_ptr.vmem [resolvable:$true] %s51_s28  ;;  %s3785_s30 = int_to_ptr.vmem [resolvable:$true] %s39_s30 }
   0x8   :  { %s3587_s1 = scalar_lea.hbm %s4236_s5, 256 }
   0x9   :  { %p3588_p0 = scmp.ne.s32.totalorder %s4236_s5, %s3587_s1  ;;  %p3591_p1 = scmp.lt.u32.totalorder %s3587_s1, %s4236_s5 }
   0xb   :  { %p3593_p2 = pnand %p3591_p1, %p3588_p0 }
   0xd   :  { %3596 = shalt.err (!%p3593_p2)
}
   0xe   :  { %s3597_s23 = scalar_lea.vmem %s52_s28, 256  ;;  %p3602_p4 = scmp.lt.s32.totalorder %s52_s28, %s52_s28 }
   0xf   :  { %p3598_p3 = scmp.ne.s32.totalorder %s52_s28, %s3597_s23  ;;  %p3603_p5 = scmp.lt.s32.totalorder %s3597_s23, %s3597_s23 }
  0x11   :  { %p3604_p6 = por %p3603_p5, %p3602_p4 }
  0x13   :  { %p3605_p7 = pnand %p3604_p6, %p3598_p3 }
  0x15   :  { %3608 = shalt.err (!%p3605_p7)
}
  0x16   :  { %s3683_s24 = smov 128   ;;  %s3684_s25 = smov 8  }
  0x17   :  { %57 = dma.hbm_to_vmem [thread:$0]  %s4236_s5, 256, %s52_s28, [#allocation9], %s3683_s24, %s3683_s24, %s3684_s25  }
  0x18   :  { %s3609_s19 = scalar_lea.hbm %s4235_s4, 256 }
  0x19   :  { %p3610_p8 = scmp.ne.s32.totalorder %s4235_s4, %s3609_s19  ;;  %p3613_p9 = scmp.lt.u32.totalorder %s3609_s19, %s4235_s4 }
  0x1b   :  { %p3615_p10 = pnand %p3613_p9, %p3610_p8 }
  0x1d   :  { %3618 = shalt.err (!%p3615_p10)
}
  0x1e   :  { %s3619_s2 = scalar_lea.vmem %s3785_s30, 256  ;;  %p3624_p12 = scmp.lt.s32.totalorder %s3785_s30, %s3785_s30 }
  0x1f   :  { %p3620_p11 = scmp.ne.s32.totalorder %s3785_s30, %s3619_s2  ;;  %p3625_p13 = scmp.lt.s32.totalorder %s3619_s2, %s3619_s2 }
  0x21   :  { %p3626_p0 = por %p3625_p13, %p3624_p12 }
  0x23   :  { %p3627_p1 = pnand %p3626_p0, %p3620_p11 }
  0x25   :  { %3630 = shalt.err (!%p3627_p1)
}
  0x26   :  { %45 = dma.hbm_to_vmem [thread:$0]  %s4235_s4, 256, %s3785_s30, [#allocation6], %s3683_s24, %s3683_s24, %s3684_s25  }
  0x27   :  { %s3685_s23 = smov [#allocation10]   ;;  %s3631_s0 = scalar_lea.hbm %s4237_s6, 256 }
  0x28   :  { %s63_s26 = sshll.u32 %s3685_s23, 4  ;;  %p3632_p2 = scmp.ne.s32.totalorder %s4237_s6, %s3631_s0  ;;  %s64_s26 = int_to_ptr.vmem [resolvable:$true] %s63_s26 }
  0x29   :  { %p3635_p3 = scmp.lt.u32.totalorder %s3631_s0, %s4237_s6 }
  0x2b   :  { %p3637_p4 = pnand %p3635_p3, %p3632_p2 }
  0x2d   :  { %3640 = shalt.err (!%p3637_p4)
}
  0x2e   :  { %s3641_s22 = scalar_lea.vmem %s64_s26, 256  ;;  %p3646_p6 = scmp.lt.s32.totalorder %s64_s26, %s64_s26 }
  0x2f   :  { %p3642_p5 = scmp.ne.s32.totalorder %s64_s26, %s3641_s22  ;;  %p3647_p7 = scmp.lt.s32.totalorder %s3641_s22, %s3641_s22 }
  0x31   :  { %p3648_p8 = por %p3647_p7, %p3646_p6 }
  0x33   :  { %p3649_p9 = pnand %p3648_p8, %p3642_p5 }
  0x35   :  { %3652 = shalt.err (!%p3649_p9)
}
  0x36   :  { %69 = dma.hbm_to_vmem [thread:$0]  %s4237_s6, 256, %s64_s26, [#allocation9], %s3683_s24, %s3683_s24, %s3684_s25  }
  0x37   :  { %3675 = dma.done.wait [#allocation6], 256  }
  0x38   :  { %3676 = vsyncadd [#allocation6], 4294967040 }
  0x39   :  { %3677 = dma.done.wait [#allocation9], 512  }
  0x3a   :  { %3678 = vsyncadd [#allocation9], 4294966784  ;;  %s4255_s28 = sld [smem:[#allocation17_spill]]  ;;  %s4256_s25 = sld [smem:[#allocation15_spill]]  ;;  %vm151_vm0 = vcmask 261120   ;;  %v297_v31 = vld [vmem:[#allocation5] sm:$0xff] }
  0x3b   :  { %s4257_s21 = sld [smem:[#allocation16_spill]]  ;;  %v298_v32 = vld [vmem:[#allocation5 + $0x8] sm:$0xff]  ;;  %v566_v34 = vld [vmem:[#allocation10] sm:$0xff]  ;;  %v444_v37 = vld [vmem:[#allocation8] sm:$0xff]  ;;  %v3686_v40 = vmov 0.0|0.0   ;;  %vm306_vm10 = vcmask 130048  }
  0x3c   :  { %v3336_v33 = vpack.c.bf16 %v298_v32, %v297_v31  ;;  %v567_v35 = vld [vmem:[#allocation10 + $0x8] sm:$0xff]  ;;  %v445_v38 = vld [vmem:[#allocation8 + $0x8] sm:$0xff]  ;;  %v2740_v41 = vld [vmem:[%s4234_s3] ss:$0 sm:$0xff]  ;;  %s3689_s6 = smov [#allocation11]  }
  0x3d   :  { %v3344_v36 = vpack.c.bf16 %v567_v35, %v566_v34  ;;  %v3340_v39 = vpack.c.bf16 %v445_v38, %v444_v37  ;;  %v692_v45 = vld [vmem:[%s4242_s11] sm:$0xff]  ;;  %v693_v46 = vld [vmem:[%s4242_s11 + $0x8] sm:$0xff]  ;;  %v694_v53 = vld [vmem:[%s4242_s11 + $0x10] sm:$0xff]  ;;  %s2729_s24 = sshll.u32 %s3689_s6, 4  ;;  %s2730_s24 = int_to_ptr.vmem [resolvable:$true] %s2729_s24 }
  0x3e   :  { %3337 = vmatprep.subr.bf16.mxu1 %v3336_v33  ;;  %v3894_v49 = vpack.c.bf16 %v693_v46, %v692_v45  ;;  %v695_v54 = vld [vmem:[%s4242_s11 + $0x18] sm:$0xff]  ;;  %p3658_p11 = scmp.lt.s32.totalorder %s2730_s24, %s2730_s24 }
  0x3f   :  { %3339 = vmatpush3.bf16.msra.mxu1 %v3336_v33  ;;  %v3907_v58 = vpack.c.bf16 %v695_v54, %v694_v53 }
  0x40   :  { %v140_v0 = vld [vmem:[%s4255_s28] sm:$0xff]  ;;  %v141_v1 = vld [vmem:[%s4255_s28 + $0x8] sm:$0xff]  ;;  %v142_v2 = vld [vmem:[%s4255_s28 + $0x10] sm:$0xff]  ;;  %3341 = vmatprep.subr.bf16.mxu1 %v3340_v39 }
  0x41   :  { %v3328_v3 = vpack.c.bf16 %v141_v1, %v140_v0  ;;  %v143_v4 = vld [vmem:[%s4255_s28 + $0x18] sm:$0xff]  ;;  %v101_v5 = vld [vmem:[%s4256_s25] sm:$0xff]  ;;  %v102_v9 = vld [vmem:[%s4256_s25 + $0x8] sm:$0xff] }
  0x42   :  { %v2739_v6 = vld [vmem:[%s4257_s21] ss:$0 sm:$0xff]  ;;  %v3332_v7 = vpack.c.bf16 %v143_v4, %v142_v2  ;;  %v103_v10 = vld [vmem:[%s4256_s25 + $0x10] sm:$0xff]  ;;  %v104_v11 = vld [vmem:[%s4256_s25 + $0x18] sm:$0xff] }
  0x43   :  { %v116_v8 = vadd.f32 %v2739_v6, %v101_v5  ;;  %3329 = vmatprep.subr.bf16.mxu0 %v3328_v3  ;;  %v117_v12 = vadd.f32 %v2739_v6, %v102_v9  ;;  %v118_v13 = vadd.f32 %v2739_v6, %v103_v10  ;;  %v105_v14 = vld [vmem:[%s4256_s25 + $0x20] sm:$0xff]  ;;  %v119_v16 = vadd.f32 %v2739_v6, %v104_v11  ;;  %v106_v18 = vld [vmem:[%s4256_s25 + $0x28] sm:$0xff]  ;;  %v107_v19 = vld [vmem:[%s4256_s25 + $0x30] sm:$0xff] }
  0x44   :  { %3331 = vmatpush3.bf16.msra.mxu0 %v3328_v3  ;;  %v120_v17 = vadd.f32 %v2739_v6, %v105_v14  ;;  %v121_v22 = vadd.f32 %v2739_v6, %v106_v18  ;;  %v122_v23 = vadd.f32 %v2739_v6, %v107_v19  ;;  %v108_v24 = vld [vmem:[%s4256_s25 + $0x38] sm:$0xff]  ;;  %v3688_v11 = vmov 0.0   ;;  %v698_v18 = vld [vmem:[%s4243_s12 + $0x10] sm:$0xff]  ;;  %s3653_s25 = scalar_lea.vmem %s2730_s24, 128 }
  0x45   :  { %vm124_vm1 = vcmp.gt.f32.partialorder %v116_v8, 1e-06  ;;  %3333 = vmatprep.subr.bf16.mxu0 %v3332_v7  ;;  %vm125_vm2 = vcmp.gt.f32.partialorder %v117_v12, 1e-06  ;;  %vm126_vm3 = vcmp.gt.f32.partialorder %v118_v13, 1e-06  ;;  %v123_v27 = vadd.f32 %v2739_v6, %v108_v24  ;;  %p3654_p10 = scmp.ne.s32.totalorder %s2730_s24, %s3653_s25  ;;  %p3659_p12 = scmp.lt.s32.totalorder %s3653_s25, %s3653_s25 }
  0x46   :  { %v132_v15 = vsel %vm124_vm1, %v116_v8, 0.0  ;;  %v133_v20 = vsel %vm125_vm2, %v117_v12, 0.0  ;;  %v134_v21 = vsel %vm126_vm3, %v118_v13, 0.0  ;;  %vm127_vm4 = vcmp.gt.f32.partialorder %v119_v16, 1e-06  ;;  %v689_v8 = vld [vmem:[%s4241_s10 + $0x8] sm:$0xff] }
  0x47   :  { %2993 = vmatprep.mubr.msk.f32.mxu0 %vm151_vm0, %v132_v15  ;;  %vm128_vm5 = vcmp.gt.f32.partialorder %v120_v17, 1e-06  ;;  %v135_v25 = vsel %vm127_vm4, %v119_v16, 0.0  ;;  %vm129_vm6 = vcmp.gt.f32.partialorder %v121_v22, 1e-06  ;;  %vm3687_vm3 = vmmov 0   ;;  %p3660_p13 = por %p3659_p12, %p3658_p11 }
  0x48   :  { %3335 = vmatpush3.bf16.msra.mxu0 %v3332_v7  ;;  %v136_v26 = vsel %vm128_vm5, %v120_v17, 0.0  ;;  %vm130_vm7 = vcmp.gt.f32.partialorder %v122_v23, 1e-06  ;;  %v137_v28 = vsel %vm129_vm6, %v121_v22, 0.0  ;;  %vm131_vm8 = vcmp.gt.f32.partialorder %v123_v27, 1e-06 }
  0x49   :  { %v138_v29 = vsel %vm130_vm7, %v122_v23, 0.0  ;;  %v139_v30 = vsel %vm131_vm8, %v123_v27, 0.0  ;;  %3345 = vmatprep.subr.bf16.mxu0 %v3344_v36  ;;  %v688_v7 = vld [vmem:[%s4241_s10] sm:$0xff]  ;;  %v690_v12 = vld [vmem:[%s4241_s10 + $0x10] sm:$0xff]  ;;  %v691_v13 = vld [vmem:[%s4241_s10 + $0x18] sm:$0xff]  ;;  %p3661_p0 = pnand %p3660_p13, %p3654_p10 }
  0x4a   :  { %v3932_v10 = vpack.c.bf16 %v689_v8, %v688_v7  ;;  %v3946_v14 = vpack.c.bf16 %v691_v13, %v690_v12  ;;  %v696_v15 = vld [vmem:[%s4243_s12] sm:$0xff]  ;;  %v697_v16 = vld [vmem:[%s4243_s12 + $0x8] sm:$0xff]  ;;  %v699_v19 = vld [vmem:[%s4243_s12 + $0x18] sm:$0xff] }
  0x4b   :  { %2994 = vmatmul.mubr.msk.f32.vlgmr.msra.gmra.mrb[0].mxu0 %vm151_vm0, %v133_v20  ;;  %v3970_v17 = vpack.c.bf16 %v697_v16, %v696_v15  ;;  %v3980_v20 = vpack.c.bf16 %v699_v19, %v698_v18  ;;  %v2767_v22 = vld [vmem:[%s4240_s9] ss:$0 sm:$0xff] }
  0x4c   :  { %2996 = vmatprep.mubr.msk.f32.mxu0 %vm151_vm0, %v134_v21  ;;  %3347 = vmatpush3.bf16.msra.mxu0 %v3344_v36  ;;  %v2749_v21 = vld [vmem:[%s4238_s7] ss:$0 sm:$0xff] }
  0x4d   :  { %3354 = vmatprep.subr.bf16.mxu0 %v3686_v40  ;;  %v4028_v16 = vld [vmem:[%s4244_s13] ss:$0 sm:$0xff] }
  0x4e   :  { %v4033_v18 = vld [vmem:[%s4245_s14] ss:$0 sm:$0xff] }
  0x4f   :  { %2997 = vmatmul.mubr.msk.f32.gmra.mrb[2].mxu0 %vm151_vm0, %v135_v25 }
  0x50   :  { %2999 = vmatprep.mubr.msk.f32.mxu0 %vm151_vm0, %v136_v26 }
  0x53   :  { %3000 = vmatmul.mubr.msk.f32.gmra.mrb[4].mxu0 %vm151_vm0, %v137_v28 }
  0x54   :  { %3002 = vmatprep.mubr.msk.f32.mxu0 %vm151_vm0, %v138_v29 }
  0x57   :  { %3003 = vmatmul.mubr.msk.f32.gmra.mrb[6].mxu0 %vm151_vm0, %v139_v30 }
 0x11e   :  { %v2995_v42 = vpop.f32.mrb[0].mxu0 }
 0x11f   :  { %v248_v43 = vadd.f32 %v2995_v42, %v2740_v41  ;;  %v242_v44 = vpop.f32.mrb[1].mxu0 }
 0x120   :  { %v243_v47 = vadd.f32 %v2740_v41, %v242_v44 }
 0x121   :  { %vm282_vm9 = vcmp.gt.f32.partialorder %v248_v43, 1e-06 }
 0x122   :  { %vm281_vm11 = vcmp.gt.f32.partialorder %v243_v47, 1e-06  ;;  %v2998_v48 = vpop.f32.mrb[2].mxu0  ;;  %v290_v55 = vsel %vm282_vm9, %v248_v43, 0.0 }
 0x123   :  { %v258_v50 = vadd.f32 %v2998_v48, %v2740_v41  ;;  %v252_v51 = vpop.f32.mrb[3].mxu0  ;;  %v289_v52 = vsel %vm281_vm11, %v243_v47, 0.0 }
 0x124   :  { %v253_v56 = vadd.f32 %v2740_v41, %v252_v51  ;;  %3009 = vmatprep.mubr.msk.f32.mxu1 %vm306_vm10, %v289_v52  ;;  %3041 = vmatprep.mubr.msk.f32.mxu0 %vm306_vm10, %v289_v52 }
 0x125   :  { %vm284_vm12 = vcmp.gt.f32.partialorder %v258_v50, 1e-06  ;;  %3010 = vmatmul.mubr.msk.f32.vlgmr.msra.gmra.mrb[0].mxu1 %vm306_vm10, %v290_v55  ;;  %3042 = vmatmul.mubr.msk.f32.vlgmr.msra.gmra.mrb[8].mxu0 %vm306_vm10, %v290_v55 }
 0x126   :  { %vm283_vm13 = vcmp.gt.f32.partialorder %v253_v56, 1e-06  ;;  %3343 = vmatpush3.bf16.msra.mxu1 %v3340_v39  ;;  %v3001_v57 = vpop.f32.mrb[4].mxu0  ;;  %3356 = vmatpush3.bf16.msra.mxu0 %v3894_v49  ;;  %v292_v62 = vsel %vm284_vm12, %v258_v50, 0.0 }
 0x127   :  { %v291_v59 = vsel %vm283_vm13, %v253_v56, 0.0  ;;  %v268_v60 = vadd.f32 %v3001_v57, %v2740_v41  ;;  %v262_v61 = vpop.f32.mrb[5].mxu0  ;;  %3348 = vmatprep.subr.bf16.mxu1 %v3686_v40  ;;  %3357 = vmatprep.subr.bf16.mxu0 %v3686_v40  ;;  %v2758_v57 = vld [vmem:[%s4239_s8] ss:$0 sm:$0xff] }
 0x128   :  { %v263_v63 = vadd.f32 %v2740_v41, %v262_v61  ;;  %3012 = vmatprep.mubr.msk.f32.mxu1 %vm306_vm10, %v291_v59  ;;  %3044 = vmatprep.mubr.msk.f32.mxu0 %vm306_vm10, %v291_v59 }
 0x129   :  { %vm286_vm14 = vcmp.gt.f32.partialorder %v268_v60, 1e-06  ;;  %3013 = vmatmul.mubr.msk.f32.gmra.mrb[2].mxu1 %vm306_vm10, %v292_v62  ;;  %3045 = vmatmul.mubr.msk.f32.gmra.mrb[10].mxu0 %vm306_vm10, %v292_v62 }
 0x12a   :  { %vm285_vm15 = vcmp.gt.f32.partialorder %v263_v63, 1e-06  ;;  %v3004_v0 = vpop.f32.mrb[6].mxu0  ;;  %3359 = vmatpush3.bf16.msra.mxu0 %v3907_v58  ;;  %v294_v4 = vsel %vm286_vm14, %v268_v60, 0.0 }
 0x12b   :  { %v293_v1 = vsel %vm285_vm15, %v263_v63, 0.0  ;;  %v278_v2 = vadd.f32 %v3004_v0, %v2740_v41  ;;  %v272_v3 = vpop.f32.mrb[7].mxu0  ;;  %3366 = vmatprep.subr.bf16.mxu0 %v3686_v40 }
 0x12c   :  { %v273_v5 = vadd.f32 %v2740_v41, %v272_v3  ;;  %3015 = vmatprep.mubr.msk.f32.mxu1 %vm306_vm10, %v293_v1  ;;  %3047 = vmatprep.mubr.msk.f32.mxu0 %vm306_vm10, %v293_v1 }
 0x12d   :  { %vm288_vm1 = vcmp.gt.f32.partialorder %v278_v2, 1e-06  ;;  %3016 = vmatmul.mubr.msk.f32.gmra.mrb[4].mxu1 %vm306_vm10, %v294_v4  ;;  %3048 = vmatmul.mubr.msk.f32.gmra.mrb[12].mxu0 %vm306_vm10, %v294_v4 }
 0x12e   :  { %vm287_vm2 = vcmp.gt.f32.partialorder %v273_v5, 1e-06  ;;  %v296_v9 = vsel %vm288_vm1, %v278_v2, 0.0 }
 0x12f   :  { %v295_v6 = vsel %vm287_vm2, %v273_v5, 0.0 }
 0x130   :  { %3018 = vmatprep.mubr.msk.f32.mxu1 %vm306_vm10, %v295_v6  ;;  %3050 = vmatprep.mubr.msk.f32.mxu0 %vm306_vm10, %v295_v6 }
 0x131   :  { %3019 = vmatmul.mubr.msk.f32.gmra.mrb[6].mxu1 %vm306_vm10, %v296_v9  ;;  %3051 = vmatmul.mubr.msk.f32.gmra.mrb[14].mxu0 %vm306_vm10, %v296_v9 }
 0x132   :  { %3025 = vmatprep.mubr.msk.f32.mxu1 %vm306_vm10, %v289_v52  ;;  %3072 = vmatprep.mubr.msk.f32.mxu0 %vm3687_vm3, %v3688_v11 }
 0x135   :  { %3026 = vmatmul.mubr.msk.f32.vlgmr.msra.gmra.mrb[8].mxu1 %vm306_vm10, %v290_v55  ;;  %3073 = vmatmul.mubr.f32.vlgmr.msra.gmra.mrb[16].mxu0 %v3688_v11 }
 0x136   :  { %3350 = vmatpush3.bf16.msra.mxu1 %v3932_v10  ;;  %3028 = vmatprep.mubr.msk.f32.mxu1 %vm306_vm10, %v291_v59 }
 0x137   :  { %3351 = vmatprep.subr.bf16.mxu1 %v3686_v40  ;;  %3368 = vmatpush3.bf16.msra.mxu0 %v3932_v10 }
 0x138   :  { %3369 = vmatprep.subr.bf16.mxu0 %v3686_v40  ;;  %3094 = vmatprep.mubr.msk.f32.mxu0 %vm3687_vm3, %v3688_v11 }
 0x139   :  { %3029 = vmatmul.mubr.msk.f32.gmra.mrb[10].mxu1 %vm306_vm10, %v292_v62 }
 0x13a   :  { %3031 = vmatprep.mubr.msk.f32.mxu1 %vm306_vm10, %v293_v1  ;;  %3353 = vmatpush3.bf16.msra.mxu1 %v3946_v14 }
 0x13b   :  { %3360 = vmatprep.subr.bf16.mxu1 %v3686_v40  ;;  %3371 = vmatpush3.bf16.msra.mxu0 %v3946_v14 }
 0x13c   :  { %3378 = vmatprep.subr.bf16.mxu0 %v3686_v40 }
 0x13d   :  { %3032 = vmatmul.mubr.msk.f32.gmra.mrb[12].mxu1 %vm306_vm10, %v294_v4 }
 0x13e   :  { %3034 = vmatprep.mubr.msk.f32.mxu1 %vm306_vm10, %v295_v6 }
 0x141   :  { %3035 = vmatmul.mubr.msk.f32.gmra.mrb[14].mxu1 %vm306_vm10, %v296_v9 }
 0x142   :  { %3061 = vmatprep.mubr.msk.f32.mxu1 %vm3687_vm3, %v3688_v11 }
 0x145   :  { %3062 = vmatmul.mubr.f32.vlgmr.msra.gmra.mrb[16].mxu1 %v3688_v11 }
 0x146   :  { %3362 = vmatpush3.bf16.msra.mxu1 %v3970_v17  ;;  %3083 = vmatprep.mubr.msk.f32.mxu1 %vm3687_vm3, %v3688_v11 }
 0x147   :  { %3363 = vmatprep.subr.bf16.mxu1 %v3686_v40 }
 0x14a   :  { %3365 = vmatpush3.bf16.msra.mxu1 %v3980_v20 }
 0x14b   :  { %3372 = vmatprep.subr.bf16.mxu1 %v3686_v40 }
 0x14d   :  { %3084 = vmatmul.mubr.f32.vlgmr.msra.gmra.mrb[18].mxu1 %v3688_v11 }
 0x14e   :  { %3374 = vmatpush3.bf16.msra.mxu1 %v3894_v49  ;;  %3105 = vmatprep.mubr.msk.f32.mxu1 %vm3687_vm3, %v3688_v11 }
 0x14f   :  { %3375 = vmatprep.subr.bf16.mxu1 %v3686_v40 }
 0x152   :  { %3377 = vmatpush3.bf16.msra.mxu1 %v3907_v58 }
 0x153   :  { %3384 = vmatprep.subr.bf16.mxu1 %v3686_v40 }
 0x1f8   :  { %v3011_v23 = vpop.f32.mrb[0].mxu1  ;;  %v3043_v24 = vpop.f32.mrb[8].mxu0 }
 0x1f9   :  { %v403_v25 = vadd.f32 %v3011_v23, %v2749_v21  ;;  %v647_v26 = vadd.f32 %v3043_v24, %v2767_v22  ;;  %v397_v27 = vpop.f32.mrb[1].mxu1  ;;  %v641_v28 = vpop.f32.mrb[9].mxu0 }
 0x1fa   :  { %v398_v29 = vadd.f32 %v2749_v21, %v397_v27  ;;  %v642_v30 = vadd.f32 %v2767_v22, %v641_v28 }
 0x1fb   :  { %437 = vst.msk [vmem:[#allocation2 + $0x8] sm:$0xff] %vm151_vm0, %v403_v25  ;;  %681 = vst.msk [vmem:[#allocation4 + $0x8] sm:$0xff] %vm151_vm0, %v647_v26 }
 0x1fc   :  { %436 = vst.msk [vmem:[#allocation2] sm:$0xff] %vm151_vm0, %v398_v29  ;;  %680 = vst.msk [vmem:[#allocation4] sm:$0xff] %vm151_vm0, %v642_v30  ;;  %v3014_v31 = vpop.f32.mrb[2].mxu1  ;;  %v3046_v32 = vpop.f32.mrb[10].mxu0 }
 0x1fd   :  { %v413_v33 = vadd.f32 %v3014_v31, %v2749_v21  ;;  %v657_v34 = vadd.f32 %v3046_v32, %v2767_v22  ;;  %v407_v35 = vpop.f32.mrb[3].mxu1  ;;  %v651_v36 = vpop.f32.mrb[11].mxu0 }
 0x1fe   :  { %v408_v37 = vadd.f32 %v2749_v21, %v407_v35  ;;  %v652_v38 = vadd.f32 %v2767_v22, %v651_v36  ;;  %v4042_v35 = vld [vmem:[%s4246_s15] ss:$0 sm:$0xff] }
 0x1ff   :  { %439 = vst.msk [vmem:[#allocation2 + $0x18] sm:$0xff] %vm151_vm0, %v413_v33  ;;  %683 = vst.msk [vmem:[#allocation4 + $0x18] sm:$0xff] %vm151_vm0, %v657_v34 }
 0x200   :  { %438 = vst.msk [vmem:[#allocation2 + $0x10] sm:$0xff] %vm151_vm0, %v408_v37  ;;  %682 = vst.msk [vmem:[#allocation4 + $0x10] sm:$0xff] %vm151_vm0, %v652_v38  ;;  %v3017_v39 = vpop.f32.mrb[4].mxu1  ;;  %v3049_v41 = vpop.f32.mrb[12].mxu0 }
 0x201   :  { %v423_v42 = vadd.f32 %v3017_v39, %v2749_v21  ;;  %v667_v43 = vadd.f32 %v3049_v41, %v2767_v22  ;;  %v417_v44 = vpop.f32.mrb[5].mxu1  ;;  %v661_v45 = vpop.f32.mrb[13].mxu0 }
 0x202   :  { %v418_v46 = vadd.f32 %v2749_v21, %v417_v44  ;;  %v662_v47 = vadd.f32 %v2767_v22, %v661_v45 }
 0x203   :  { %441 = vst.msk [vmem:[#allocation2 + $0x28] sm:$0xff] %vm151_vm0, %v423_v42  ;;  %685 = vst.msk [vmem:[#allocation4 + $0x28] sm:$0xff] %vm151_vm0, %v667_v43  ;;  %v703_v24 = vld [vmem:[#allocation2] sm:$0xff] }
 0x204   :  { %440 = vst.msk [vmem:[#allocation2 + $0x20] sm:$0xff] %vm151_vm0, %v418_v46  ;;  %684 = vst.msk [vmem:[#allocation4 + $0x20] sm:$0xff] %vm151_vm0, %v662_v47  ;;  %v3020_v48 = vpop.f32.mrb[6].mxu1  ;;  %v3052_v50 = vpop.f32.mrb[14].mxu0  ;;  %v705_v41 = vld [vmem:[#allocation4] sm:$0xff] }
 0x205   :  { %v433_v51 = vadd.f32 %v3020_v48, %v2749_v21  ;;  %v677_v52 = vadd.f32 %v3052_v50, %v2767_v22  ;;  %v427_v53 = vpop.f32.mrb[7].mxu1  ;;  %v671_v54 = vpop.f32.mrb[15].mxu0 }
 0x206   :  { %v428_v55 = vadd.f32 %v2749_v21, %v427_v53  ;;  %v672_v56 = vadd.f32 %v2767_v22, %v671_v54 }
 0x207   :  { %443 = vst.msk [vmem:[#allocation2 + $0x38] sm:$0xff] %vm151_vm0, %v433_v51  ;;  %687 = vst.msk [vmem:[#allocation4 + $0x38] sm:$0xff] %vm151_vm0, %v677_v52 }
 0x208   :  { %442 = vst.msk [vmem:[#allocation2 + $0x30] sm:$0xff] %vm151_vm0, %v428_v55  ;;  %686 = vst.msk [vmem:[#allocation4 + $0x30] sm:$0xff] %vm151_vm0, %v672_v56  ;;  %v3027_v59 = vpop.f32.mrb[8].mxu1  ;;  %v857_v60 = vpop.f32.mrb[16].mxu0  ;;  %v959_v55 = vld [vmem:[#allocation2 + $0x8] sm:$0xff] }
 0x209   :  { %v525_v61 = vadd.f32 %v3027_v59, %v2758_v57  ;;  %v519_v62 = vpop.f32.mrb[9].mxu1  ;;  %v3074_v63 = vpop.f32.mrb[17].mxu0  ;;  %v858_v23 = vadd.f32 %v4033_v18, %v857_v60 }
 0x20a   :  { %v520_v0 = vadd.f32 %v2758_v57, %v519_v62 }
 0x20b   :  { %559 = vst.msk [vmem:[#allocation3 + $0x8] sm:$0xff] %vm151_vm0, %v525_v61 }
 0x20c   :  { %558 = vst.msk [vmem:[#allocation3] sm:$0xff] %vm151_vm0, %v520_v0  ;;  %v3030_v1 = vpop.f32.mrb[10].mxu1 }
 0x20d   :  { %v535_v2 = vadd.f32 %v3030_v1, %v2758_v57  ;;  %v529_v3 = vpop.f32.mrb[11].mxu1 }
 0x20e   :  { %v530_v4 = vadd.f32 %v2758_v57, %v529_v3 }
 0x20f   :  { %561 = vst.msk [vmem:[#allocation3 + $0x18] sm:$0xff] %vm151_vm0, %v535_v2 }
 0x210   :  { %560 = vst.msk [vmem:[#allocation3 + $0x10] sm:$0xff] %vm151_vm0, %v530_v4  ;;  %v3033_v5 = vpop.f32.mrb[12].mxu1 }
 0x211   :  { %v545_v6 = vadd.f32 %v3033_v5, %v2758_v57  ;;  %v539_v7 = vpop.f32.mrb[13].mxu1 }
 0x212   :  { %v540_v8 = vadd.f32 %v2758_v57, %v539_v7  ;;  %v961_v60 = vld [vmem:[#allocation3 + $0x8] sm:$0xff] }
 0x213   :  { %563 = vst.msk [vmem:[#allocation3 + $0x28] sm:$0xff] %vm151_vm0, %v545_v6  ;;  %v704_v25 = vld [vmem:[#allocation3] sm:$0xff] }
 0x214   :  { %562 = vst.msk [vmem:[#allocation3 + $0x20] sm:$0xff] %vm151_vm0, %v540_v8  ;;  %v3036_v9 = vpop.f32.mrb[14].mxu1  ;;  %v944_v28 = vadd.f32 %v858_v23, %v704_v25  ;;  %v963_v8 = vld [vmem:[#allocation4 + $0x8] sm:$0xff] }
 0x215   :  { %v555_v12 = vadd.f32 %v3036_v9, %v2758_v57  ;;  %v549_v13 = vpop.f32.mrb[15].mxu1 }
 0x216   :  { %v550_v15 = vadd.f32 %v2758_v57, %v549_v13  ;;  %v2780_v31 = vmul.f32 -1.442695, %v944_v28  ;;  %v1199_v28 = vld [vmem:[#allocation2 + $0x10] sm:$0xff] }
 0x217   :  { %565 = vst.msk [vmem:[#allocation3 + $0x38] sm:$0xff] %vm151_vm0, %v555_v12 }
 0x218   :  { %564 = vst.msk [vmem:[#allocation3 + $0x30] sm:$0xff] %vm151_vm0, %v550_v15  ;;  %v781_v19 = vpop.f32.mrb[16].mxu1 }
 0x219   :  { %v782_v21 = vadd.f32 %v4028_v16, %v781_v19  ;;  %v3063_v22 = vpop.f32.mrb[17].mxu1 }
 0x21b   :  { %v937_v26 = vadd.f32 %v782_v21, %v703_v24 }
 0x21d   :  { %v2779_v27 = vmul.f32 -1.442695, %v937_v26 }
 0x21f   :  { %3507 = vpow2.f32 %v2779_v27 }
 0x220   :  { %v933_v29 = vpop.f32.mrb[18].mxu1  ;;  %3509 = vpow2.f32 %v2780_v31 }
 0x221   :  { %v3085_v30 = vpop.f32.mrb[19].mxu1  ;;  %v934_v37 = vadd.f32 %v4042_v35, %v933_v29 }
 0x229   :  { %v3508_v32 = vpop.eup %3507 }
 0x22a   :  { %v941_v33 = vadd.f32 1.0, %v3508_v32  ;;  %v3510_v34 = vpop.eup %3509  ;;  %v1201_v32 = vld [vmem:[#allocation3 + $0x10] sm:$0xff] }
 0x22b   :  { %v948_v36 = vadd.f32 1.0, %v3510_v34 }
 0x22c   :  { %3511 = vrcp.f32 %v941_v33 }
 0x22d   :  { %3513 = vrcp.f32 %v948_v36 }
 0x236   :  { %v3512_v38 = vpop.eup %3511 }
 0x237   :  { %v951_v39 = vmul.f32 %v3512_v38, %v934_v37  ;;  %v3514_v43 = vpop.eup %3513 }
 0x238   :  { %v954_v44 = vsub.f32 1.0, %v3514_v43  ;;  %v956_v47 = vmul.f32 0.0, %v3514_v43 }
 0x239   :  { %v952_v42 = vadd.f32 %v951_v39, %v705_v41 }
 0x23b   :  { %3515 = vtanh.f32 %v952_v42 }
 0x245   :  { %v3516_v45 = vpop.eup %3515 }
 0x246   :  { %v955_v46 = vmul.f32 %v3516_v45, %v954_v44 }
 0x248   :  { %v957_v48 = vadd.f32 %v956_v47, %v955_v46  ;;  %v1203_v46 = vld [vmem:[#allocation4 + $0x10] sm:$0xff] }
 0x24a   :  { %3095 = vmatmul.mubr.msk.f32.vlgmr.msra.gmra.mrb[18].mxu0 %vm151_vm0, %v957_v48  ;;  %3106 = vmatmul.mubr.msk.f32.vlgmr.msra.gmra.mrb[20].mxu1 %vm151_vm0, %v957_v48 }
 0x24b   :  { %3380 = vmatpush3.bf16.msra.mxu0 %v3970_v17  ;;  %3116 = vmatprep.mubr.msk.f32.mxu0 %vm3687_vm3, %v3688_v11 }
 0x24c   :  { %3381 = vmatprep.subr.bf16.mxu0 %v3686_v40  ;;  %3386 = vmatpush3.bf16.msra.mxu1 %v3932_v10 }
 0x24d   :  { %3387 = vmatprep.subr.bf16.mxu1 %v3686_v40  ;;  %3127 = vmatprep.mubr.msk.f32.mxu1 %vm3687_vm3, %v3688_v11 }
 0x24f   :  { %3383 = vmatpush3.bf16.msra.mxu0 %v3980_v20 }
 0x250   :  { %3390 = vmatprep.subr.bf16.mxu0 %v3686_v40  ;;  %3389 = vmatpush3.bf16.msra.mxu1 %v3946_v14 }
 0x251   :  { %3396 = vmatprep.subr.bf16.mxu1 %v3686_v40 }
 0x252   :  { %3117 = vmatmul.mubr.msk.f32.vlgmr.msra.gmra.mrb[20].mxu0 %vm151_vm0, %v957_v48 }
 0x253   :  { %3392 = vmatpush3.bf16.msra.mxu0 %v3894_v49  ;;  %3138 = vmatprep.mubr.msk.f32.mxu0 %vm3687_vm3, %v3688_v11 }
 0x254   :  { %3393 = vmatprep.subr.bf16.mxu0 %v3686_v40 }
 0x257   :  { %3395 = vmatpush3.bf16.msra.mxu0 %v3907_v58 }
 0x258   :  { %3402 = vmatprep.subr.bf16.mxu0 %v3686_v40 }
 0x31d   :  { %v1033_v50 = vpop.f32.mrb[18].mxu0  ;;  %v1103_v51 = vpop.f32.mrb[20].mxu1 }
 0x31e   :  { %v1034_v52 = vadd.f32 %v4028_v16, %v1033_v50  ;;  %v3096_v53 = vpop.f32.mrb[19].mxu0  ;;  %v3107_v54 = vpop.f32.mrb[21].mxu1  ;;  %v1104_v56 = vadd.f32 %v4033_v18, %v1103_v51 }
 0x320   :  { %v1177_v57 = vadd.f32 %v1034_v52, %v959_v55  ;;  %v1184_v61 = vadd.f32 %v1104_v56, %v961_v60 }
 0x322   :  { %v2784_v59 = vmul.f32 -1.442695, %v1177_v57  ;;  %v2785_v0 = vmul.f32 -1.442695, %v1184_v61  ;;  %v1439_v61 = vld [vmem:[#allocation2 + $0x18] sm:$0xff] }
 0x324   :  { %3517 = vpow2.f32 %v2784_v59 }
 0x325   :  { %v1173_v62 = vpop.f32.mrb[20].mxu0  ;;  %3519 = vpow2.f32 %v2785_v0 }
 0x326   :  { %v3118_v63 = vpop.f32.mrb[21].mxu0  ;;  %v1174_v5 = vadd.f32 %v4042_v35, %v1173_v62 }
 0x32e   :  { %v3518_v1 = vpop.eup %3517 }
 0x32f   :  { %v1181_v2 = vadd.f32 1.0, %v3518_v1  ;;  %v3520_v3 = vpop.eup %3519  ;;  %v1441_v1 = vld [vmem:[#allocation3 + $0x18] sm:$0xff] }
 0x330   :  { %v1188_v4 = vadd.f32 1.0, %v3520_v3 }
 0x331   :  { %3521 = vrcp.f32 %v1181_v2 }
 0x332   :  { %3523 = vrcp.f32 %v1188_v4 }
 0x33b   :  { %v3522_v6 = vpop.eup %3521 }
 0x33c   :  { %v1191_v7 = vmul.f32 %v3522_v6, %v1174_v5  ;;  %v3524_v12 = vpop.eup %3523 }
 0x33d   :  { %v1194_v13 = vsub.f32 1.0, %v3524_v12  ;;  %v1196_v21 = vmul.f32 %v3524_v12, %v957_v48 }
 0x33e   :  { %v1192_v9 = vadd.f32 %v1191_v7, %v963_v8 }
 0x340   :  { %3525 = vtanh.f32 %v1192_v9 }
 0x34a   :  { %v3526_v15 = vpop.eup %3525 }
 0x34b   :  { %v1195_v19 = vmul.f32 %v3526_v15, %v1194_v13 }
 0x34d   :  { %v1197_v22 = vadd.f32 %v1196_v21, %v1195_v19  ;;  %v1443_v19 = vld [vmem:[#allocation4 + $0x18] sm:$0xff] }
 0x34f   :  { %3128 = vmatmul.mubr.msk.f32.vlgmr.msra.gmra.mrb[22].mxu1 %vm151_vm0, %v1197_v22  ;;  %3139 = vmatmul.mubr.msk.f32.vlgmr.msra.gmra.mrb[22].mxu0 %vm151_vm0, %v1197_v22 }
 0x350   :  { %3398 = vmatpush3.bf16.msra.mxu1 %v3970_v17  ;;  %3149 = vmatprep.mubr.msk.f32.mxu1 %vm3687_vm3, %v3688_v11 }
 0x351   :  { %3399 = vmatprep.subr.bf16.mxu1 %v3686_v40  ;;  %3404 = vmatpush3.bf16.msra.mxu0 %v3932_v10 }
 0x352   :  { %3405 = vmatprep.subr.bf16.mxu0 %v3686_v40  ;;  %3160 = vmatprep.mubr.msk.f32.mxu0 %vm3687_vm3, %v3688_v11 }
 0x354   :  { %3401 = vmatpush3.bf16.msra.mxu1 %v3980_v20 }
 0x355   :  { %3408 = vmatprep.subr.bf16.mxu1 %v3686_v40  ;;  %3407 = vmatpush3.bf16.msra.mxu0 %v3946_v14 }
 0x356   :  { %3414 = vmatprep.subr.bf16.mxu0 %v3686_v40 }
 0x357   :  { %3150 = vmatmul.mubr.msk.f32.vlgmr.msra.gmra.mrb[24].mxu1 %vm151_vm0, %v1197_v22 }
 0x358   :  { %3410 = vmatpush3.bf16.msra.mxu1 %v3894_v49  ;;  %3171 = vmatprep.mubr.msk.f32.mxu1 %vm3687_vm3, %v3688_v11 }
 0x359   :  { %3411 = vmatprep.subr.bf16.mxu1 %v3686_v40 }
 0x35c   :  { %3413 = vmatpush3.bf16.msra.mxu1 %v3907_v58 }
 0x35d   :  { %3420 = vmatprep.subr.bf16.mxu1 %v3686_v40 }
 0x422   :  { %v1273_v23 = vpop.f32.mrb[22].mxu1  ;;  %v1343_v24 = vpop.f32.mrb[22].mxu0 }
 0x423   :  { %v1274_v25 = vadd.f32 %v4028_v16, %v1273_v23  ;;  %v3129_v26 = vpop.f32.mrb[23].mxu1  ;;  %v3140_v27 = vpop.f32.mrb[23].mxu0  ;;  %v1344_v29 = vadd.f32 %v4033_v18, %v1343_v24 }
 0x425   :  { %v1417_v30 = vadd.f32 %v1274_v25, %v1199_v28  ;;  %v1424_v33 = vadd.f32 %v1344_v29, %v1201_v32 }
 0x427   :  { %v2789_v31 = vmul.f32 -1.442695, %v1417_v30  ;;  %v2790_v37 = vmul.f32 -1.442695, %v1424_v33  ;;  %v1679_v33 = vld [vmem:[#allocation2 + $0x20] sm:$0xff] }
 0x429   :  { %3527 = vpow2.f32 %v2789_v31 }
 0x42a   :  { %v1413_v34 = vpop.f32.mrb[24].mxu1  ;;  %3529 = vpow2.f32 %v2790_v37 }
 0x42b   :  { %v3151_v36 = vpop.f32.mrb[25].mxu1  ;;  %v1414_v43 = vadd.f32 %v4042_v35, %v1413_v34 }
 0x433   :  { %v3528_v38 = vpop.eup %3527 }
 0x434   :  { %v1421_v39 = vadd.f32 1.0, %v3528_v38  ;;  %v3530_v41 = vpop.eup %3529  ;;  %v1681_v38 = vld [vmem:[#allocation3 + $0x20] sm:$0xff] }
 0x435   :  { %v1428_v42 = vadd.f32 1.0, %v3530_v41 }
 0x436   :  { %3531 = vrcp.f32 %v1421_v39 }
 0x437   :  { %3533 = vrcp.f32 %v1428_v42 }
 0x440   :  { %v3532_v44 = vpop.eup %3531 }
 0x441   :  { %v1431_v45 = vmul.f32 %v3532_v44, %v1414_v43  ;;  %v3534_v48 = vpop.eup %3533 }
 0x442   :  { %v1434_v50 = vsub.f32 1.0, %v3534_v48  ;;  %v1436_v53 = vmul.f32 %v3534_v48, %v1197_v22 }
 0x443   :  { %v1432_v47 = vadd.f32 %v1431_v45, %v1203_v46 }
 0x445   :  { %3535 = vtanh.f32 %v1432_v47 }
 0x44f   :  { %v3536_v51 = vpop.eup %3535 }
 0x450   :  { %v1435_v52 = vmul.f32 %v3536_v51, %v1434_v50 }
 0x452   :  { %v1437_v54 = vadd.f32 %v1436_v53, %v1435_v52  ;;  %v1683_v52 = vld [vmem:[#allocation4 + $0x20] sm:$0xff] }
 0x454   :  { %3161 = vmatmul.mubr.msk.f32.vlgmr.msra.gmra.mrb[24].mxu0 %vm151_vm0, %v1437_v54  ;;  %3172 = vmatmul.mubr.msk.f32.vlgmr.msra.gmra.mrb[26].mxu1 %vm151_vm0, %v1437_v54 }
 0x455   :  { %3416 = vmatpush3.bf16.msra.mxu0 %v3970_v17  ;;  %3182 = vmatprep.mubr.msk.f32.mxu0 %vm3687_vm3, %v3688_v11 }
 0x456   :  { %3417 = vmatprep.subr.bf16.mxu0 %v3686_v40  ;;  %3422 = vmatpush3.bf16.msra.mxu1 %v3932_v10 }
 0x457   :  { %3423 = vmatprep.subr.bf16.mxu1 %v3686_v40  ;;  %3193 = vmatprep.mubr.msk.f32.mxu1 %vm3687_vm3, %v3688_v11 }
 0x459   :  { %3419 = vmatpush3.bf16.msra.mxu0 %v3980_v20 }
 0x45a   :  { %3426 = vmatprep.subr.bf16.mxu0 %v3686_v40  ;;  %3425 = vmatpush3.bf16.msra.mxu1 %v3946_v14 }
 0x45b   :  { %3432 = vmatprep.subr.bf16.mxu1 %v3686_v40 }
 0x45c   :  { %3183 = vmatmul.mubr.msk.f32.vlgmr.msra.gmra.mrb[26].mxu0 %vm151_vm0, %v1437_v54 }
 0x45d   :  { %3428 = vmatpush3.bf16.msra.mxu0 %v3894_v49  ;;  %3204 = vmatprep.mubr.msk.f32.mxu0 %vm3687_vm3, %v3688_v11 }
 0x45e   :  { %3429 = vmatprep.subr.bf16.mxu0 %v3686_v40 }
 0x461   :  { %3431 = vmatpush3.bf16.msra.mxu0 %v3907_v58 }
 0x462   :  { %3438 = vmatprep.subr.bf16.mxu0 %v3686_v40 }
 0x527   :  { %v1513_v55 = vpop.f32.mrb[24].mxu0  ;;  %v1583_v56 = vpop.f32.mrb[26].mxu1 }
 0x528   :  { %v1514_v57 = vadd.f32 %v4028_v16, %v1513_v55  ;;  %v3162_v59 = vpop.f32.mrb[25].mxu0  ;;  %v3173_v60 = vpop.f32.mrb[27].mxu1  ;;  %v1584_v62 = vadd.f32 %v4033_v18, %v1583_v56 }
 0x52a   :  { %v1657_v63 = vadd.f32 %v1514_v57, %v1439_v61  ;;  %v1664_v2 = vadd.f32 %v1584_v62, %v1441_v1 }
 0x52c   :  { %v2794_v0 = vmul.f32 -1.442695, %v1657_v63  ;;  %v2795_v5 = vmul.f32 -1.442695, %v1664_v2  ;;  %v1919_v2 = vld [vmem:[#allocation2 + $0x28] sm:$0xff] }
 0x52e   :  { %3537 = vpow2.f32 %v2794_v0 }
 0x52f   :  { %v1653_v3 = vpop.f32.mrb[26].mxu0  ;;  %3539 = vpow2.f32 %v2795_v5 }
 0x530   :  { %v3184_v4 = vpop.f32.mrb[27].mxu0  ;;  %v1654_v12 = vadd.f32 %v4042_v35, %v1653_v3 }
 0x538   :  { %v3538_v6 = vpop.eup %3537 }
 0x539   :  { %v1661_v7 = vadd.f32 1.0, %v3538_v6  ;;  %v3540_v8 = vpop.eup %3539  ;;  %v1921_v6 = vld [vmem:[#allocation3 + $0x28] sm:$0xff] }
 0x53a   :  { %v1668_v9 = vadd.f32 1.0, %v3540_v8 }
 0x53b   :  { %3541 = vrcp.f32 %v1661_v7 }
 0x53c   :  { %3543 = vrcp.f32 %v1668_v9 }
 0x545   :  { %v3542_v13 = vpop.eup %3541 }
 0x546   :  { %v1671_v15 = vmul.f32 %v3542_v13, %v1654_v12  ;;  %v3544_v22 = vpop.eup %3543 }
 0x547   :  { %v1674_v23 = vsub.f32 1.0, %v3544_v22  ;;  %v1676_v26 = vmul.f32 %v3544_v22, %v1437_v54 }
 0x548   :  { %v1672_v21 = vadd.f32 %v1671_v15, %v1443_v19 }
 0x54a   :  { %3545 = vtanh.f32 %v1672_v21 }
 0x554   :  { %v3546_v24 = vpop.eup %3545 }
 0x555   :  { %v1675_v25 = vmul.f32 %v3546_v24, %v1674_v23 }
 0x557   :  { %v1677_v27 = vadd.f32 %v1676_v26, %v1675_v25  ;;  %v1923_v25 = vld [vmem:[#allocation4 + $0x28] sm:$0xff] }
 0x559   :  { %3194 = vmatmul.mubr.msk.f32.vlgmr.msra.gmra.mrb[28].mxu1 %vm151_vm0, %v1677_v27  ;;  %3205 = vmatmul.mubr.msk.f32.vlgmr.msra.gmra.mrb[28].mxu0 %vm151_vm0, %v1677_v27 }
 0x55a   :  { %3434 = vmatpush3.bf16.msra.mxu1 %v3970_v17  ;;  %3215 = vmatprep.mubr.msk.f32.mxu1 %vm3687_vm3, %v3688_v11 }
 0x55b   :  { %3435 = vmatprep.subr.bf16.mxu1 %v3686_v40  ;;  %3440 = vmatpush3.bf16.msra.mxu0 %v3932_v10 }
 0x55c   :  { %3441 = vmatprep.subr.bf16.mxu0 %v3686_v40  ;;  %3226 = vmatprep.mubr.msk.f32.mxu0 %vm3687_vm3, %v3688_v11 }
 0x55e   :  { %3437 = vmatpush3.bf16.msra.mxu1 %v3980_v20 }
 0x55f   :  { %3444 = vmatprep.subr.bf16.mxu1 %v3686_v40  ;;  %3443 = vmatpush3.bf16.msra.mxu0 %v3946_v14 }
 0x560   :  { %3450 = vmatprep.subr.bf16.mxu0 %v3686_v40 }
 0x561   :  { %3216 = vmatmul.mubr.msk.f32.vlgmr.msra.gmra.mrb[30].mxu1 %vm151_vm0, %v1677_v27 }
 0x562   :  { %3446 = vmatpush3.bf16.msra.mxu1 %v3894_v49  ;;  %3237 = vmatprep.mubr.msk.f32.mxu1 %vm3687_vm3, %v3688_v11 }
 0x563   :  { %3447 = vmatprep.subr.bf16.mxu1 %v3686_v40 }
 0x566   :  { %3449 = vmatpush3.bf16.msra.mxu1 %v3907_v58 }
 0x567   :  { %3456 = vmatprep.subr.bf16.mxu1 %v3686_v40 }
 0x62c   :  { %v1753_v28 = vpop.f32.mrb[28].mxu1  ;;  %v1823_v29 = vpop.f32.mrb[28].mxu0 }
 0x62d   :  { %v1754_v30 = vadd.f32 %v4028_v16, %v1753_v28  ;;  %v3195_v31 = vpop.f32.mrb[29].mxu1  ;;  %v3206_v32 = vpop.f32.mrb[29].mxu0  ;;  %v1824_v34 = vadd.f32 %v4033_v18, %v1823_v29 }
 0x62f   :  { %v1897_v36 = vadd.f32 %v1754_v30, %v1679_v33  ;;  %v1904_v39 = vadd.f32 %v1824_v34, %v1681_v38 }
 0x631   :  { %v2799_v37 = vmul.f32 -1.442695, %v1897_v36  ;;  %v2800_v43 = vmul.f32 -1.442695, %v1904_v39 }
 0x633   :  { %3547 = vpow2.f32 %v2799_v37  ;;  %v2159_v37 = vld [vmem:[#allocation2 + $0x30] sm:$0xff] }
 0x634   :  { %v1893_v41 = vpop.f32.mrb[30].mxu1  ;;  %3549 = vpow2.f32 %v2800_v43 }
 0x635   :  { %v3217_v42 = vpop.f32.mrb[31].mxu1  ;;  %v1894_v48 = vadd.f32 %v4042_v35, %v1893_v41  ;;  %v2161_v41 = vld [vmem:[#allocation3 + $0x30] sm:$0xff] }
 0x63d   :  { %v3548_v44 = vpop.eup %3547 }
 0x63e   :  { %v1901_v45 = vadd.f32 1.0, %v3548_v44  ;;  %v3550_v46 = vpop.eup %3549 }
 0x63f   :  { %v1908_v47 = vadd.f32 1.0, %v3550_v46 }
 0x640   :  { %3551 = vrcp.f32 %v1901_v45 }
 0x641   :  { %3553 = vrcp.f32 %v1908_v47 }
 0x64a   :  { %v3552_v50 = vpop.eup %3551 }
 0x64b   :  { %v1911_v51 = vmul.f32 %v3552_v50, %v1894_v48  ;;  %v3554_v54 = vpop.eup %3553 }
 0x64c   :  { %v1914_v55 = vsub.f32 1.0, %v3554_v54  ;;  %v1916_v59 = vmul.f32 %v3554_v54, %v1677_v27 }
 0x64d   :  { %v1912_v53 = vadd.f32 %v1911_v51, %v1683_v52 }
 0x64f   :  { %3555 = vtanh.f32 %v1912_v53  ;;  %v2163_v53 = vld [vmem:[#allocation4 + $0x30] sm:$0xff] }
 0x659   :  { %v3556_v56 = vpop.eup %3555 }
 0x65a   :  { %v1915_v57 = vmul.f32 %v3556_v56, %v1914_v55 }
 0x65c   :  { %v1917_v60 = vadd.f32 %v1916_v59, %v1915_v57 }
 0x65e   :  { %3227 = vmatmul.mubr.msk.f32.vlgmr.msra.gmra.mrb[30].mxu0 %vm151_vm0, %v1917_v60  ;;  %3238 = vmatmul.mubr.msk.f32.vlgmr.msra.gmra.mrb[32].mxu1 %vm151_vm0, %v1917_v60 }
 0x65f   :  { %3452 = vmatpush3.bf16.msra.mxu0 %v3970_v17  ;;  %3248 = vmatprep.mubr.msk.f32.mxu0 %vm3687_vm3, %v3688_v11 }
 0x660   :  { %3453 = vmatprep.subr.bf16.mxu0 %v3686_v40  ;;  %3458 = vmatpush3.bf16.msra.mxu1 %v3932_v10 }
 0x661   :  { %3459 = vmatprep.subr.bf16.mxu1 %v3686_v40  ;;  %3259 = vmatprep.mubr.msk.f32.mxu1 %vm3687_vm3, %v3688_v11 }
 0x663   :  { %3455 = vmatpush3.bf16.msra.mxu0 %v3980_v20 }
 0x664   :  { %3462 = vmatprep.subr.bf16.mxu0 %v3686_v40  ;;  %3461 = vmatpush3.bf16.msra.mxu1 %v3946_v14 }
 0x665   :  { %3468 = vmatprep.subr.bf16.mxu1 %v3686_v40 }
 0x666   :  { %3249 = vmatmul.mubr.msk.f32.vlgmr.msra.gmra.mrb[32].mxu0 %vm151_vm0, %v1917_v60 }
 0x667   :  { %3464 = vmatpush3.bf16.msra.mxu0 %v3894_v49  ;;  %3270 = vmatprep.mubr.msk.f32.mxu0 %vm3687_vm3, %v3688_v11 }
 0x668   :  { %3465 = vmatprep.subr.bf16.mxu0 %v3686_v40 }
 0x66b   :  { %3467 = vmatpush3.bf16.msra.mxu0 %v3907_v58 }
 0x66c   :  { %3474 = vmatprep.subr.bf16.mxu0 %v3686_v40 }
 0x731   :  { %v1993_v61 = vpop.f32.mrb[30].mxu0  ;;  %v2063_v62 = vpop.f32.mrb[32].mxu1 }
 0x732   :  { %v1994_v63 = vadd.f32 %v4028_v16, %v1993_v61  ;;  %v3228_v0 = vpop.f32.mrb[31].mxu0  ;;  %v3239_v1 = vpop.f32.mrb[33].mxu1  ;;  %v2064_v3 = vadd.f32 %v4033_v18, %v2063_v62  ;;  %v2638_v62 = vld [vmem:[%s4247_s16] sm:$0xff] }
 0x734   :  { %v2137_v4 = vadd.f32 %v1994_v63, %v1919_v2  ;;  %v2144_v7 = vadd.f32 %v2064_v3, %v1921_v6  ;;  %v2640_v63 = vld [vmem:[%s4247_s16 + $0x10] sm:$0xff]  ;;  %v2399_v6 = vld [vmem:[#allocation2 + $0x38] sm:$0xff] }
 0x736   :  { %v2804_v5 = vmul.f32 -1.442695, %v2137_v4  ;;  %v2805_v12 = vmul.f32 -1.442695, %v2144_v7 }
 0x738   :  { %3557 = vpow2.f32 %v2804_v5 }
 0x739   :  { %v2133_v8 = vpop.f32.mrb[32].mxu0  ;;  %3559 = vpow2.f32 %v2805_v12  ;;  %v2401_v12 = vld [vmem:[#allocation3 + $0x38] sm:$0xff] }
 0x73a   :  { %v3250_v9 = vpop.f32.mrb[33].mxu0  ;;  %v2134_v22 = vadd.f32 %v4042_v35, %v2133_v8 }
 0x742   :  { %v3558_v13 = vpop.eup %3557 }
 0x743   :  { %v2141_v15 = vadd.f32 1.0, %v3558_v13  ;;  %v3560_v19 = vpop.eup %3559 }
 0x744   :  { %v2148_v21 = vadd.f32 1.0, %v3560_v19 }
 0x745   :  { %3561 = vrcp.f32 %v2141_v15 }
 0x746   :  { %3563 = vrcp.f32 %v2148_v21 }
 0x74f   :  { %v3562_v23 = vpop.eup %3561 }
 0x750   :  { %v2151_v24 = vmul.f32 %v3562_v23, %v2134_v22  ;;  %v3564_v27 = vpop.eup %3563 }
 0x751   :  { %v2154_v28 = vsub.f32 1.0, %v3564_v27  ;;  %v2156_v31 = vmul.f32 %v3564_v27, %v1917_v60 }
 0x752   :  { %v2152_v26 = vadd.f32 %v2151_v24, %v1923_v25 }
 0x754   :  { %3565 = vtanh.f32 %v2152_v26 }
 0x75e   :  { %v3566_v29 = vpop.eup %3565 }
 0x75f   :  { %v2155_v30 = vmul.f32 %v3566_v29, %v2154_v28 }
 0x761   :  { %v2157_v32 = vadd.f32 %v2156_v31, %v2155_v30 }
 0x763   :  { %3260 = vmatmul.mubr.msk.f32.vlgmr.msra.gmra.mrb[34].mxu1 %vm151_vm0, %v2157_v32  ;;  %3271 = vmatmul.mubr.msk.f32.vlgmr.msra.gmra.mrb[34].mxu0 %vm151_vm0, %v2157_v32 }
 0x764   :  { %3470 = vmatpush3.bf16.msra.mxu1 %v3970_v17  ;;  %3281 = vmatprep.mubr.msk.f32.mxu1 %vm3687_vm3, %v3688_v11 }
 0x765   :  { %3471 = vmatprep.subr.bf16.mxu1 %v3686_v40  ;;  %3476 = vmatpush3.bf16.msra.mxu0 %v3932_v10 }
 0x766   :  { %3477 = vmatprep.subr.bf16.mxu0 %v3686_v40  ;;  %3292 = vmatprep.mubr.msk.f32.mxu0 %vm3687_vm3, %v3688_v11 }
 0x768   :  { %3473 = vmatpush3.bf16.msra.mxu1 %v3980_v20 }
 0x769   :  { %3480 = vmatprep.subr.bf16.mxu1 %v3686_v40  ;;  %3479 = vmatpush3.bf16.msra.mxu0 %v3946_v14 }
 0x76a   :  { %3486 = vmatprep.subr.bf16.mxu0 %v3686_v40 }
 0x76b   :  { %3282 = vmatmul.mubr.msk.f32.vlgmr.msra.gmra.mrb[36].mxu1 %vm151_vm0, %v2157_v32 }
 0x76c   :  { %3482 = vmatpush3.bf16.msra.mxu1 %v3894_v49  ;;  %3303 = vmatprep.mubr.msk.f32.mxu1 %vm3687_vm3, %v3688_v11 }
 0x76d   :  { %3483 = vmatprep.subr.bf16.mxu1 %v3686_v40 }
 0x770   :  { %3485 = vmatpush3.bf16.msra.mxu1 %v3907_v58 }
 0x771   :  { %3492 = vmatprep.subr.bf16.mxu1 %v3686_v40 }
 0x836   :  { %v2233_v10 = vpop.f32.mrb[34].mxu1  ;;  %v2303_v33 = vpop.f32.mrb[34].mxu0 }
 0x837   :  { %v2234_v34 = vadd.f32 %v4028_v16, %v2233_v10  ;;  %v3261_v14 = vpop.f32.mrb[35].mxu1  ;;  %v3272_v36 = vpop.f32.mrb[35].mxu0  ;;  %v2304_v38 = vadd.f32 %v4033_v18, %v2303_v33  ;;  %v2816_v33 = vld [vmem:[%s4248_s17] ss:$0 sm:$0xff] }
 0x839   :  { %v2377_v39 = vadd.f32 %v2234_v34, %v2159_v37  ;;  %v2384_v42 = vadd.f32 %v2304_v38, %v2161_v41 }
 0x83b   :  { %v2809_v49 = vmul.f32 -1.442695, %v2377_v39  ;;  %v2810_v45 = vmul.f32 -1.442695, %v2384_v42 }
 0x83d   :  { %3567 = vpow2.f32 %v2809_v49 }
 0x83e   :  { %v2373_v43 = vpop.f32.mrb[36].mxu1  ;;  %3569 = vpow2.f32 %v2810_v45 }
 0x83f   :  { %v3283_v44 = vpop.f32.mrb[37].mxu1  ;;  %v2374_v50 = vadd.f32 %v4042_v35, %v2373_v43 }
 0x847   :  { %v3568_v58 = vpop.eup %3567 }
 0x848   :  { %v2381_v46 = vadd.f32 1.0, %v3568_v58  ;;  %v3570_v47 = vpop.eup %3569 }
 0x849   :  { %v2388_v48 = vadd.f32 1.0, %v3570_v47 }
 0x84a   :  { %3571 = vrcp.f32 %v2381_v46 }
 0x84b   :  { %3573 = vrcp.f32 %v2388_v48 }
 0x854   :  { %v3572_v51 = vpop.eup %3571 }
 0x855   :  { %v2391_v52 = vmul.f32 %v3572_v51, %v2374_v50  ;;  %v3574_v55 = vpop.eup %3573 }
 0x856   :  { %v2394_v56 = vsub.f32 1.0, %v3574_v55  ;;  %v2396_v60 = vmul.f32 %v3574_v55, %v2157_v32 }
 0x857   :  { %v2392_v54 = vadd.f32 %v2391_v52, %v2163_v53 }
 0x859   :  { %3575 = vtanh.f32 %v2392_v54 }
 0x863   :  { %v3576_v57 = vpop.eup %3575 }
 0x864   :  { %v2395_v59 = vmul.f32 %v3576_v57, %v2394_v56 }
 0x866   :  { %v2397_v61 = vadd.f32 %v2396_v60, %v2395_v59 }
 0x868   :  { %3293 = vmatmul.mubr.msk.f32.vlgmr.msra.gmra.mrb[36].mxu0 %vm151_vm0, %v2397_v61  ;;  %3304 = vmatmul.mubr.msk.f32.vlgmr.msra.gmra.mrb[38].mxu1 %vm151_vm0, %v2397_v61 }
 0x869   :  { %3488 = vmatpush3.bf16.msra.mxu0 %v3970_v17  ;;  %3314 = vmatprep.mubr.msk.f32.mxu0 %vm3687_vm3, %v3688_v11  ;;  %v2639_v17 = vld [vmem:[%s4247_s16 + $0x8] sm:$0xff] }
 0x86a   :  { %3489 = vmatprep.subr.bf16.mxu0 %v3686_v40  ;;  %3325 = vmatprep.mubr.msk.f32.mxu1 %vm3687_vm3, %v3688_v11  ;;  %v3493_v0 = vpack.c.bf16 %v2639_v17, %v2638_v62  ;;  %v2641_v11 = vld [vmem:[%s4247_s16 + $0x18] sm:$0xff] }
 0x86c   :  { %3494 = vmatpush3.bf16.msra.mxu1 %v3493_v0 }
 0x86d   :  { %3491 = vmatpush3.bf16.msra.mxu0 %v3980_v20  ;;  %v3496_v20 = vpack.c.bf16 %v2641_v11, %v2640_v63  ;;  %3495 = vmatprep.subr.bf16.mxu1 %v3686_v40 }
 0x870   :  { %3315 = vmatmul.mubr.msk.f32.vlgmr.msra.gmra.mrb[38].mxu0 %vm151_vm0, %v2397_v61  ;;  %3497 = vmatpush3.bf16.msra.mxu1 %v3496_v20 }
 0x93b   :  { %v2473_v1 = vpop.f32.mrb[36].mxu0  ;;  %v2543_v2 = vpop.f32.mrb[38].mxu1 }
 0x93c   :  { %v2474_v3 = vadd.f32 %v4028_v16, %v2473_v1  ;;  %v3294_v4 = vpop.f32.mrb[37].mxu0  ;;  %v3305_v5 = vpop.f32.mrb[39].mxu1  ;;  %v2544_v7 = vadd.f32 %v4033_v18, %v2543_v2  ;;  %v2403_v18 = vld [vmem:[#allocation4 + $0x38] sm:$0xff] }
 0x93e   :  { %v2617_v8 = vadd.f32 %v2474_v3, %v2399_v6  ;;  %v2624_v13 = vadd.f32 %v2544_v7, %v2401_v12 }
 0x940   :  { %v2814_v9 = vmul.f32 -1.442695, %v2617_v8  ;;  %v2815_v21 = vmul.f32 -1.442695, %v2624_v13 }
 0x942   :  { %3577 = vpow2.f32 %v2814_v9 }
 0x943   :  { %v2613_v15 = vpop.f32.mrb[38].mxu0  ;;  %3579 = vpow2.f32 %v2815_v21 }
 0x944   :  { %v3316_v19 = vpop.f32.mrb[39].mxu0  ;;  %v2614_v16 = vadd.f32 %v4042_v35, %v2613_v15 }
 0x94c   :  { %v3578_v40 = vpop.eup %3577 }
 0x94d   :  { %v2621_v22 = vadd.f32 1.0, %v3578_v40  ;;  %v3580_v23 = vpop.eup %3579 }
 0x94e   :  { %v2628_v24 = vadd.f32 1.0, %v3580_v23 }
 0x94f   :  { %3581 = vrcp.f32 %v2621_v22 }
 0x950   :  { %3583 = vrcp.f32 %v2628_v24 }
 0x959   :  { %v3582_v25 = vpop.eup %3581 }
 0x95a   :  { %v2631_v26 = vmul.f32 %v3582_v25, %v2614_v16  ;;  %v3584_v28 = vpop.eup %3583 }
 0x95b   :  { %v2634_v29 = vsub.f32 1.0, %v3584_v28  ;;  %v2636_v32 = vmul.f32 %v3584_v28, %v2397_v61 }
 0x95c   :  { %v2632_v27 = vadd.f32 %v2631_v26, %v2403_v18 }
 0x95e   :  { %3585 = vtanh.f32 %v2632_v27 }
 0x968   :  { %v3586_v30 = vpop.eup %3585 }
 0x969   :  { %v2635_v31 = vmul.f32 %v3586_v30, %v2634_v29 }
 0x96b   :  { %v2637_v10 = vadd.f32 %v2636_v32, %v2635_v31 }
 0x96d   :  { %3326 = vmatmul.mubr.msk.f32.vlgmr.msra.gmra.mrb[40].mxu1 %vm151_vm0, %v2637_v10 }
 0xa40   :  { %v2718_v35 = vpop.f32.mrb[40].mxu1 }
 0xa41   :  { %v2719_v34 = vadd.f32 %v2816_v33, %v2718_v35  ;;  %v3327_v14 = vpop.f32.mrb[41].mxu1 }
 0xa43   :  { %2722 = vst [vmem:[#allocation11] sm:$0xff] %v2719_v34 }
 0xa44   :  { %3664 = shalt.err (!%p3661_p0)
}
 0xa45   :  { %s3665_s21 = scalar_lea.hbm %s4249_s18, 128 }
 0xa46   :  { %p3666_p1 = scmp.ne.s32.totalorder %s4249_s18, %s3665_s21  ;;  %p3669_p2 = scmp.lt.u32.totalorder %s3665_s21, %s4249_s18 }
 0xa48   :  { %p3671_p3 = pnand %p3669_p2, %p3666_p1 }
 0xa4a   :  { %3674 = shalt.err (!%p3671_p3)
}
 0xa4b   :  { %2732 = dma.vmem_to_hbm [thread:$0]  %s2730_s24, 128, %s4249_s18, [#allocation7]  }
 0xa4c   :  { %3679 = dma.done.wait [#allocation7], 128  }
 0xa4d   :  { %3680 = vsyncadd [#allocation7], 4294967168 }
 0xa4e   :  { %2736 = vsyncpa [#allocation6], 1 }
 0xa4f   :  { %2737 = vsyncpa [#allocation9], 1 }
 0xa50   :  { %2738 = vsyncpa [#allocation7], 1 }

</bundles_post_ra>
